<compile_context>
chip_gen: v6e
topology: v6e:2x2x1
jax: 0.10.0
libtpu: 0.0.40
codegen_flags: <defaults>
</compile_context>

<pallas_src>
import functools

import numpy as np
import jax
import jax.numpy as jnp
from jax.experimental import pallas as pl
from jax.experimental.pallas import tpu as pltpu


# ---------------------------------------------------------------------------
# Static index tables (mirror the PyTorch registered buffers)
# ---------------------------------------------------------------------------
def get_unfold_idx(H, W, ws):
    H_ = H - (ws - 1)
    W_ = W - (ws - 1)
    h_idx = np.tile(np.arange(W_), H_)
    w_idx = np.repeat(np.arange(H_), W_) * W
    k_idx_1 = np.tile(np.arange(ws), ws)
    k_idx_2 = np.repeat(np.arange(ws), ws) * W
    k_idx = k_idx_1 + k_idx_2
    hw_idx = h_idx + w_idx
    return hw_idx[:, None] + k_idx[None, :]            # (H_*W_, ws*ws)


def get_attn_idx(H, W, ws):
    H_ = H - (ws - 1)
    W_ = W - (ws - 1)
    pad = ws // 2
    base = np.arange(H_ * W_).reshape(H_, W_)
    base = np.pad(base, ((pad, pad), (pad, pad)), mode="edge").reshape(-1)
    return get_unfold_idx(H, W, ws)[base]              # (H*W, ws*ws)


def get_bias_idx(H, W, ws):
    idx_h = np.arange(ws)
    idx_w = np.arange(ws)
    idx_k = (idx_h[:, None] * (2 * ws - 1) + idx_w).reshape(-1)
    num_repeat_h = np.ones(ws, dtype=np.int64)
    num_repeat_w = np.ones(ws, dtype=np.int64)
    num_repeat_h[ws // 2] = H - (ws - 1)
    num_repeat_w[ws // 2] = W - (ws - 1)
    bias_hw = (np.repeat(idx_h, num_repeat_h)[:, None] * (2 * ws - 1)
               + np.repeat(idx_w, num_repeat_w)[None, :])
    bias_idx = bias_hw[..., None] + idx_k
    return bias_idx.reshape(-1, ws * ws)               # (H*W, ws*ws)


# ---------------------------------------------------------------------------
# Banded tiling choice + fused bias/mask table
# ---------------------------------------------------------------------------
def _choose_row_tiling(H, W, ws):
    """Pick (rows_per_tile, band_rows).

    band_rows >= ws (the key band covers every query's window rows) and is
    chosen so band_rows * W is a multiple of 128 lanes when possible.
    rows_per_tile divides H and satisfies rows_per_tile <= band_rows - ws + 1
    so one band serves every query row of the tile.  We prefer row tiles whose
    sublane extent (rows_per_tile * W) is a multiple of 8.
    """
    band = None
    for b in range(ws, H + 1):
        if (b * W) % 128 == 0:
            band = b
            break
    if band is None:
        band = min(H, ws)
    rq_cap = max(1, band - ws + 1)
    rows_per_tile = 1
    for cand in range(1, min(rq_cap, H) + 1):
        if H % cand == 0 and cand * W <= 512:
            if (cand * W) % 8 == 0 or (rows_per_tile * W) % 8 != 0:
                rows_per_tile = cand
    return rows_per_tile, band


def _build_band_bias_mask(relative_bias, H, W, ws, nh, rows_per_tile, band_rows):
    """(n_tiles, nh, TQ, BK) table: relative bias inside the window, -1e30 outside."""
    K = ws * ws
    pad = ws // 2
    n_tiles = H // rows_per_tile
    TQ = rows_per_tile * W
    BK = band_rows * W

    attn_idx = get_attn_idx(H, W, ws)                       # (HW, K) global key ids
    bias_idx = get_bias_idx(H, W, ws)                       # (HW, K)
    band_start = np.clip(np.arange(n_tiles) * rows_per_tile - pad,
                         0, H - band_rows)                  # (n_tiles,) rows
    band_pos = (attn_idx.reshape(n_tiles, TQ, K)
                - (band_start * W)[:, None, None])          # position inside band
    assert band_pos.min() >= 0 and band_pos.max() < BK

    bias_vals = relative_bias[jnp.asarray(bias_idx, jnp.int32)]   # (HW, K, nh)
    bias_vals = bias_vals.reshape(n_tiles, TQ, K, nh)

    bm = jnp.full((n_tiles, TQ, BK, nh), -1e30, jnp.float32)
    tt = np.arange(n_tiles)[:, None, None]
    qq = np.arange(TQ)[None, :, None]
    bm = bm.at[tt, qq, band_pos].set(bias_vals)             # distinct targets
    return bm.transpose(0, 3, 1, 2)                         # (n_tiles, nh, TQ, BK)


# ---------------------------------------------------------------------------
# Pallas kernels
# ---------------------------------------------------------------------------
def _matmul_bias_kernel(x_ref, w_ref, b_ref, o_ref):
    # 1x1 conv == dense matmul over channels (+ bias), MXU with f32 accumulate.
    o_ref[...] = (jnp.dot(x_ref[...], w_ref[...],
                          preferred_element_type=jnp.float32)
                  + b_ref[...]).astype(o_ref.dtype)


def pointwise_conv(x2d, w, b):
    """1x1 conv as a row-tiled matmul: (M, Cin) @ (Cin, Cout) + (Cout,)."""
    M, Cin = x2d.shape
    Cout = w.shape[1]
    tm = M
    for cand in (256, 128, 512, 64, 1024, 32, 16, 8):
        if M % cand == 0 and cand < M:
            tm = cand
            break
    # TODO(synk): on v6e/v7x cast operands to bf16 (keep f32 accumulation) to
    # halve HBM/VMEM traffic; kept f32 here to match the f32 reference tightly.
    return pl.pallas_call(
        _matmul_bias_kernel,
        out_shape=jax.ShapeDtypeStruct((M, Cout), x2d.dtype),
        grid=(M // tm,),
        in_specs=[pl.BlockSpec((tm, Cin), lambda i: (i, 0)),
                  pl.BlockSpec((Cin, Cout), lambda i: (0, 0)),
                  pl.BlockSpec((1, Cout), lambda i: (0, 0))],
        out_specs=pl.BlockSpec((tm, Cout), lambda i: (i, 0)),
        compiler_params=pltpu.CompilerParams(
            dimension_semantics=("parallel",)),
    )(x2d, w, b.reshape(1, Cout))


def _na_banded_proj_kernel(kv_ref, bmask_ref, pw_ref, pb_ref, o_ref, *,
                           nh, hd, H, W, pad, band_rows, rows_per_tile):
    """Banded neighborhood attention + fused output projection for one
    (batch, query-row-tile) grid cell.

    kv_ref   : (1, HW, 3C)   whole-image fused qkv slab (q pre-scaled), VMEM
                             resident across the inner row-tile grid axis.
                             Both q rows and the K/V band are sliced from it.
    bmask_ref: (1, nh, TQ, BK) relative bias inside window, -1e30 outside
    pw_ref   : (C, C)        proj weight (already transposed: in x out)
    pb_ref   : (1, C)        proj bias
    o_ref    : (1, TQ, C)    projected output, all heads folded in
    """
    C = nh * hd
    TQ = rows_per_tile * W
    BK = band_rows * W
    t = pl.program_id(1)

    q_start = t * TQ
    if TQ % 8 == 0:
        q_start = pl.multiple_of(q_start, 8)
    band_start = jnp.clip(t * rows_per_tile - pad, 0, H - band_rows)
    k_start = band_start * W
    if W % 8 == 0:
        k_start = pl.multiple_of(k_start, 8)

    acc = None
    for h in range(nh):
        q_h = kv_ref[0, pl.ds(q_start, TQ), h * hd:(h + 1) * hd]          # (TQ, hd)
        k_h = kv_ref[0, pl.ds(k_start, BK),
                     C + h * hd:C + (h + 1) * hd]                         # (BK, hd)
        v_h = kv_ref[0, pl.ds(k_start, BK),
                     2 * C + h * hd:2 * C + (h + 1) * hd]                 # (BK, hd)

        # scores = q @ K_band^T on the MXU (contract head_dim of both operands)
        s = jax.lax.dot_general(q_h, k_h, (((1,), (1,)), ((), ())),
                                preferred_element_type=jnp.float32)       # (TQ, BK)
        s = s + bmask_ref[0, h]            # relative bias / -1e30 outside window
        s = s - jnp.max(s, axis=-1, keepdims=True)
        p = jnp.exp(s)
        p = p * pl.reciprocal(jnp.sum(p, axis=-1, keepdims=True), approx=True)
        o_h = jnp.dot(p, v_h, preferred_element_type=jnp.float32)         # (TQ, hd)

        # Fused output projection: head h's context only sees rows
        # [h*hd, (h+1)*hd) of proj_w^T.  Accumulating here removes both the
        # lane-axis head concat and a full HBM round-trip of the attn output.
        y_h = jnp.dot(o_h, pw_ref[h * hd:(h + 1) * hd, :],
                      preferred_element_type=jnp.float32)                 # (TQ, C)
        acc = y_h if acc is None else acc + y_h

    o_ref[0] = (acc + pb_ref[...]).astype(o_ref.dtype)                    # (TQ, C)


def neighborhood_attention_core(qkv3, bmask, proj_wt, proj_b, *, B, H, W, nh,
                                hd, pad, rows_per_tile, band_rows):
    """qkv3: (B, HW, 3C) fused qkv (q pre-scaled) -> (B, HW, C) projected out."""
    HW = H * W
    C = nh * hd
    TQ = rows_per_tile * W
    BK = band_rows * W
    n_tiles = H // rows_per_tile

    kernel = functools.partial(
        _na_banded_proj_kernel, nh=nh, hd=hd, H=H, W=W, pad=pad,
        band_rows=band_rows, rows_per_tile=rows_per_tile)

    return pl.pallas_call(
        kernel,
        out_shape=jax.ShapeDtypeStruct((B, HW, C), qkv3.dtype),
        grid=(B, n_tiles),
        in_specs=[
            # per-batch fused qkv slab: constant block index across the inner
            # row-tile axis -> DMAed once per batch, resident in VMEM; query
            # rows AND the K/V band are both sliced from it in-kernel.
            pl.BlockSpec((1, HW, 3 * C), lambda b, t: (b, 0, 0)),
            # banded bias+mask table for this row tile (shared across batch)
            pl.BlockSpec((1, nh, TQ, BK), lambda b, t: (t, 0, 0, 0)),
            # proj weight/bias (tiny, constant block)
            pl.BlockSpec((C, C), lambda b, t: (0, 0)),
            pl.BlockSpec((1, C), lambda b, t: (0, 0)),
        ],
        out_specs=pl.BlockSpec((1, TQ, C), lambda b, t: (b, t, 0)),
        compiler_params=pltpu.CompilerParams(
            dimension_semantics=("parallel", "arbitrary")),
    )(qkv3, bmask, proj_wt, proj_b)


# ---------------------------------------------------------------------------
# Forward pass (glue in plain JAX, hot paths in Pallas)
# ---------------------------------------------------------------------------
def neighborhood_attention_forward(x, params, num_heads, window_size):
    B, C, H, W = x.shape
    HW = H * W
    nh = num_heads
    hd = C // nh
    ws = window_size
    pad = ws // 2
    scale = float(hd) ** (-0.5)

    rows_per_tile, band_rows = _choose_row_tiling(H, W, ws)

    # --- entry layout: NCHW -> pixel-major (B*HW, C), done exactly once -----
    x_pm = x.reshape(B, C, HW).transpose(0, 2, 1).reshape(B * HW, C)

    # --- qkv 1x1 conv; 1/sqrt(hd) folded into the q slice of W and b --------
    qkv_w = params["qkv_w"].at[:C, :].multiply(scale)
    qkv_b = params["qkv_b"].at[:C].multiply(scale)
    qkv = pointwise_conv(x_pm, qkv_w.T, qkv_b)              # (B*HW, 3C)
    qkv3 = qkv.reshape(B, HW, 3 * C)

    # --- banded bias + neighborhood mask (replaces the per-pixel K/V gather)
    bmask = _build_band_bias_mask(params["relative_bias"], H, W, ws, nh,
                                  rows_per_tile, band_rows)

    # --- banded attention core + fused output projection (Pallas, MXU) ------
    # attn_drop / proj_drop have p = 0.0 -> identity.
    # TODO(synk): for very large H*W (v7x's 64 MiB VMEM) the resident per-batch
    # kv slab should itself be band-tiled via manual make_async_copy DMA, and
    # the qkv 1x1 conv could be fused into the band compute as well.
    y = neighborhood_attention_core(
        qkv3, bmask, params["proj_w"].T, params["proj_b"].reshape(1, C),
        B=B, H=H, W=W, nh=nh, hd=hd, pad=pad,
        rows_per_tile=rows_per_tile, band_rows=band_rows)   # (B, HW, C)

    # --- exit layout ---------------------------------------------------------
    return y.transpose(0, 2, 1).reshape(B, C, H, W)


# ---------------------------------------------------------------------------
# Pure-JAX reference (for correctness check)
# ---------------------------------------------------------------------------
def neighborhood_attention_reference(x, params, attn_idx, bias_idx,
                                     num_heads, window_size):
    B, C, H, W = x.shape
    HW = H * W
    nh = num_heads
    hd = C // nh
    scale = float(hd) ** (-0.5)
    x2 = x.reshape(B, C, HW).transpose(0, 2, 1)
    qkv = x2 @ params["qkv_w"].T + params["qkv_b"]
    qkv = qkv.reshape(B, HW, 3, nh, hd).transpose(2, 0, 3, 1, 4)  # (3,B,nh,HW,hd)
    q, k, v = qkv[0] * scale, qkv[1], qkv[2]
    kg = k[:, :, attn_idx]                                        # (B,nh,HW,K,hd)
    vg = v[:, :, attn_idx]
    attn = jnp.einsum("bnqd,bnqkd->bnqk", q, kg)
    attn = attn + params["relative_bias"][bias_idx].transpose(2, 0, 1)[None]
    attn = jax.nn.softmax(attn, axis=-1)
    out = jnp.einsum("bnqk,bnqkd->bnqd", attn, vg)
    y2 = out.transpose(0, 2, 1, 3).reshape(B, HW, C)
    y2 = y2 @ params["proj_w"].T + params["proj_b"]
    return y2.transpose(0, 2, 1).reshape(B, C, H, W)


# ---------------------------------------------------------------------------
if __name__ == "__main__":
    B, dim, H, W = 2, 32, 16, 16
    num_heads, window_size = 4, 7

    key = jax.random.PRNGKey(0)
    kx, k1, k2, k3, k4, k5 = jax.random.split(key, 6)
    x = jax.random.normal(kx, (B, dim, H, W), jnp.float32)

    # Deterministic synthetic parameters (shapes match the PyTorch module).
    params = {
        "qkv_w": jax.random.normal(k1, (3 * dim, dim), jnp.float32) * 0.05,
        "qkv_b": jax.random.normal(k2, (3 * dim,), jnp.float32) * 0.02,
        "proj_w": jax.random.normal(k3, (dim, dim), jnp.float32) * 0.05,
        "proj_b": jax.random.normal(k4, (dim,), jnp.float32) * 0.02,
        "relative_bias": jax.random.truncated_normal(
            k5, -2.0, 2.0,
            ((2 * window_size - 1) ** 2, num_heads), jnp.float32) * 0.02,
    }

    fwd = jax.jit(functools.partial(neighborhood_attention_forward,
                                    num_heads=num_heads,
                                    window_size=window_size))
    out = jax.block_until_ready(fwd(x, params))
    assert out.shape == (B, dim, H, W)

    attn_idx = jnp.asarray(get_attn_idx(H, W, window_size), jnp.int32)
    bias_idx = jnp.asarray(get_bias_idx(H, W, window_size), jnp.int32)
    ref = neighborhood_attention_reference(
        x, params, attn_idx, bias_idx, num_heads, window_size)
    np.testing.assert_allclose(np.asarray(out), np.asarray(ref),
                               atol=2e-3, rtol=2e-3)

    print("KERNEL_OK")
</pallas_src>

<mosaic_0001>
module attributes {stable_mosaic.version = 11 : i64} {
  func.func @_matmul_bias_kernel(%arg0: i32, %arg1: memref<256x32xf32, #tpu.memory_space<vmem>>, %arg2: memref<32x96xf32, #tpu.memory_space<vmem>>, %arg3: memref<1x96xf32, #tpu.memory_space<vmem>>, %arg4: memref<256x96xf32, #tpu.memory_space<vmem>>) attributes {dimension_semantics = [#tpu.dimension_semantics<parallel>], iteration_bounds = array<i64: 2>, scalar_prefetch = 0 : i64, scratch_operands = 0 : i64, tpu.core_type = #tpu.core_type<tc>, window_params = [{transform_indices = @transform_0, window_bounds = array<i64: 256, 32>}, {pipeline_mode = #tpu.pipeline_mode<synchronous>, transform_indices = @transform_1, window_bounds = array<i64: 32, 96>}, {pipeline_mode = #tpu.pipeline_mode<synchronous>, transform_indices = @transform_2, window_bounds = array<i64: 1, 96>}, {transform_indices = @transform_3, window_bounds = array<i64: 256, 96>}]} {
    %c0 = arith.constant 0 : index
    %c0_0 = arith.constant 0 : index
    %0 = vector.load %arg1[%c0, %c0_0] : memref<256x32xf32, #tpu.memory_space<vmem>>, vector<256x32xf32>
    %c0_1 = arith.constant 0 : index
    %c0_2 = arith.constant 0 : index
    %1 = vector.load %arg2[%c0_1, %c0_2] : memref<32x96xf32, #tpu.memory_space<vmem>>, vector<32x96xf32>
    %cst = arith.constant dense<0.000000e+00> : vector<256x96xf32>
    %2 = tpu.matmul %0, %1, %cst {dimension_numbers = #tpu.dot_dimension_numbers<[1], [0], [0], [1], [0, 0, 1, 1], [], []>} : vector<256x32xf32>, vector<32x96xf32>, vector<256x96xf32> -> vector<256x96xf32>
    %c0_3 = arith.constant 0 : index
    %c0_4 = arith.constant 0 : index
    %3 = vector.load %arg3[%c0_3, %c0_4] : memref<1x96xf32, #tpu.memory_space<vmem>>, vector<1x96xf32>
    %4 = vector.broadcast %3 : vector<1x96xf32> to vector<256x96xf32>
    %5 = arith.addf %2, %4 : vector<256x96xf32>
    %c0_5 = arith.constant 0 : index
    %c0_6 = arith.constant 0 : index
    %6 = vector.load %arg4[%c0_5, %c0_6] : memref<256x96xf32, #tpu.memory_space<vmem>>, vector<256x96xf32>
    tpu.vector_store %arg4[%c0_5, %c0_6], %5 {strides = array<i32>} : memref<256x96xf32, #tpu.memory_space<vmem>>, vector<256x96xf32>,
    return
  }
  func.func @transform_0(%arg0: i32) -> (i32, i32) {
    %c0_i32 = arith.constant 0 : i32
    %c0_i32_0 = arith.constant 0 : i32
    return %arg0, %c0_i32 : i32, i32
  }
  func.func @transform_1(%arg0: i32) -> (i32, i32) {
    %c0_i32 = arith.constant 0 : i32
    %c0_i32_0 = arith.constant 0 : i32
    %c0_i32_1 = arith.constant 0 : i32
    return %c0_i32, %c0_i32_0 : i32, i32
  }
  func.func @transform_2(%arg0: i32) -> (i32, i32) {
    %c0_i32 = arith.constant 0 : i32
    %c0_i32_0 = arith.constant 0 : i32
    %c0_i32_1 = arith.constant 0 : i32
    return %c0_i32, %c0_i32_0 : i32, i32
  }
  func.func @transform_3(%arg0: i32) -> (i32, i32) {
    %c0_i32 = arith.constant 0 : i32
    %c0_i32_0 = arith.constant 0 : i32
    return %arg0, %c0_i32 : i32, i32
  }
}

module attributes {stable_mosaic.version = 11 : i64} {
  func.func @_na_banded_proj_kernel(%arg0: i32, %arg1: i32, %arg2: memref<1x256x96xf32, #tpu.memory_space<vmem>>, %arg3: memref<1x4x32x128xf32, #tpu.memory_space<vmem>>, %arg4: memref<32x32xf32, #tpu.memory_space<vmem>>, %arg5: memref<1x32xf32, #tpu.memory_space<vmem>>, %arg6: memref<1x32x32xf32, #tpu.memory_space<vmem>>) attributes {dimension_semantics = [#tpu.dimension_semantics<parallel>, #tpu.dimension_semantics<arbitrary>], iteration_bounds = array<i64: 2, 8>, scalar_prefetch = 0 : i64, scratch_operands = 0 : i64, tpu.core_type = #tpu.core_type<tc>, window_params = [{transform_indices = @transform_0, window_bounds = array<i64: 1, 256, 96>}, {transform_indices = @transform_1, window_bounds = array<i64: 1, 4, 32, 128>}, {pipeline_mode = #tpu.pipeline_mode<synchronous>, transform_indices = @transform_2, window_bounds = array<i64: 32, 32>}, {pipeline_mode = #tpu.pipeline_mode<synchronous>, transform_indices = @transform_3, window_bounds = array<i64: 1, 32>}, {transform_indices = @transform_4, window_bounds = array<i64: 1, 32, 32>}]} {
    %c32_i32 = arith.constant 32 : i32
    %0 = arith.muli %arg1, %c32_i32 : i32
    %1 = tpu.assume_multiple %0, 8 : i32
    %c2_i32 = arith.constant 2 : i32
    %2 = arith.muli %arg1, %c2_i32 : i32
    %c3_i32 = arith.constant 3 : i32
    %3 = arith.subi %2, %c3_i32 : i32
    %c0_i32 = arith.constant 0 : i32
    %c8_i32 = arith.constant 8 : i32
    %4 = arith.maxsi %c0_i32, %3 : i32
    %5 = arith.minsi %c8_i32, %4 : i32
    %c16_i32 = arith.constant 16 : i32
    %6 = arith.muli %5, %c16_i32 : i32
    %7 = tpu.assume_multiple %6, 8 : i32
    %c0 = arith.constant 0 : index
    %8 = arith.index_cast %1 : i32 to index
    %c0_0 = arith.constant 0 : index
    %9 = vector.load %arg2[%c0, %8, %c0_0] : memref<1x256x96xf32, #tpu.memory_space<vmem>>, vector<1x32x8xf32>
    %10 = vector.shape_cast %9 : vector<1x32x8xf32> to vector<32x8xf32>
    %c0_1 = arith.constant 0 : index
    %11 = arith.index_cast %7 : i32 to index
    %c32 = arith.constant 32 : index
    %12 = vector.load %arg2[%c0_1, %11, %c32] : memref<1x256x96xf32, #tpu.memory_space<vmem>>, vector<1x128x8xf32>
    %13 = vector.shape_cast %12 : vector<1x128x8xf32> to vector<128x8xf32>
    %c0_2 = arith.constant 0 : index
    %14 = arith.index_cast %7 : i32 to index
    %c64 = arith.constant 64 : index
    %15 = vector.load %arg2[%c0_2, %14, %c64] : memref<1x256x96xf32, #tpu.memory_space<vmem>>, vector<1x128x8xf32>
    %16 = vector.shape_cast %15 : vector<1x128x8xf32> to vector<128x8xf32>
    %cst = arith.constant dense<0.000000e+00> : vector<32x128xf32>
    %17 = tpu.matmul %10, %13, %cst {dimension_numbers = #tpu.dot_dimension_numbers<[1], [1], [0], [0], [0, 0, 1, 0], [], []>} : vector<32x8xf32>, vector<128x8xf32>, vector<32x128xf32> -> vector<32x128xf32>
    %c0_3 = arith.constant 0 : index
    %c0_4 = arith.constant 0 : index
    %c0_5 = arith.constant 0 : index
    %c0_6 = arith.constant 0 : index
    %18 = vector.load %arg3[%c0_3, %c0_4, %c0_5, %c0_6] : memref<1x4x32x128xf32, #tpu.memory_space<vmem>>, vector<1x1x32x128xf32>
    %19 = vector.shape_cast %18 : vector<1x1x32x128xf32> to vector<32x128xf32>
    %20 = arith.addf %17, %19 : vector<32x128xf32>
    %cst_7 = arith.constant dense<0xFF800000> : vector<32xf32>
    %21 = vector.multi_reduction <maximumf>, %20, %cst_7 [1] : vector<32x128xf32> to vector<32xf32>
    %22 = vector.shape_cast %21 : vector<32xf32> to vector<32x1xf32>
    %23 = vector.broadcast %22 : vector<32x1xf32> to vector<32x128xf32>
    %24 = arith.subf %20, %23 : vector<32x128xf32>
    %25 = math.exp %24 : vector<32x128xf32>
    %cst_8 = arith.constant dense<0.000000e+00> : vector<32xf32>
    %26 = vector.multi_reduction <add>, %25, %cst_8 [1] : vector<32x128xf32> to vector<32xf32>
    %27 = vector.shape_cast %26 : vector<32xf32> to vector<32x1xf32>
    %28 = tpu.reciprocal %27 {approx = true} : vector<32x1xf32> -> vector<32x1xf32>
    %29 = vector.broadcast %28 : vector<32x1xf32> to vector<32x128xf32>
    %30 = arith.mulf %25, %29 : vector<32x128xf32>
    %cst_9 = arith.constant dense<0.000000e+00> : vector<32x8xf32>
    %31 = tpu.matmul %30, %16, %cst_9 {dimension_numbers = #tpu.dot_dimension_numbers<[1], [0], [0], [1], [0, 0, 1, 1], [], []>} : vector<32x128xf32>, vector<128x8xf32>, vector<32x8xf32> -> vector<32x8xf32>
    %c0_10 = arith.constant 0 : index
    %c0_11 = arith.constant 0 : index
    %32 = vector.load %arg4[%c0_10, %c0_11] : memref<32x32xf32, #tpu.memory_space<vmem>>, vector<8x32xf32>
    %cst_12 = arith.constant dense<0.000000e+00> : vector<32x32xf32>
    %33 = tpu.matmul %31, %32, %cst_12 {dimension_numbers = #tpu.dot_dimension_numbers<[1], [0], [0], [1], [0, 0, 1, 1], [], []>} : vector<32x8xf32>, vector<8x32xf32>, vector<32x32xf32> -> vector<32x32xf32>
    %c0_13 = arith.constant 0 : index
    %34 = arith.index_cast %1 : i32 to index
    %c8 = arith.constant 8 : index
    %35 = vector.load %arg2[%c0_13, %34, %c8] : memref<1x256x96xf32, #tpu.memory_space<vmem>>, vector<1x32x8xf32>
    %36 = vector.shape_cast %35 : vector<1x32x8xf32> to vector<32x8xf32>
    %c0_14 = arith.constant 0 : index
    %37 = arith.index_cast %7 : i32 to index
    %c40 = arith.constant 40 : index
    %38 = vector.load %arg2[%c0_14, %37, %c40] : memref<1x256x96xf32, #tpu.memory_space<vmem>>, vector<1x128x8xf32>
    %39 = vector.shape_cast %38 : vector<1x128x8xf32> to vector<128x8xf32>
    %c0_15 = arith.constant 0 : index
    %40 = arith.index_cast %7 : i32 to index
    %c72 = arith.constant 72 : index
    %41 = vector.load %arg2[%c0_15, %40, %c72] : memref<1x256x96xf32, #tpu.memory_space<vmem>>, vector<1x128x8xf32>
    %42 = vector.shape_cast %41 : vector<1x128x8xf32> to vector<128x8xf32>
    %cst_16 = arith.constant dense<0.000000e+00> : vector<32x128xf32>
    %43 = tpu.matmul %36, %39, %cst_16 {dimension_numbers = #tpu.dot_dimension_numbers<[1], [1], [0], [0], [0, 0, 1, 0], [], []>} : vector<32x8xf32>, vector<128x8xf32>, vector<32x128xf32> -> vector<32x128xf32>
    %c0_17 = arith.constant 0 : index
    %c1 = arith.constant 1 : index
    %c0_18 = arith.constant 0 : index
    %c0_19 = arith.constant 0 : index
    %44 = vector.load %arg3[%c0_17, %c1, %c0_18, %c0_19] : memref<1x4x32x128xf32, #tpu.memory_space<vmem>>, vector<1x1x32x128xf32>
    %45 = vector.shape_cast %44 : vector<1x1x32x128xf32> to vector<32x128xf32>
    %46 = arith.addf %43, %45 : vector<32x128xf32>
    %cst_20 = arith.constant dense<0xFF800000> : vector<32xf32>
    %47 = vector.multi_reduction <maximumf>, %46, %cst_20 [1] : vector<32x128xf32> to vector<32xf32>
    %48 = vector.shape_cast %47 : vector<32xf32> to vector<32x1xf32>
    %49 = vector.broadcast %48 : vector<32x1xf32> to vector<32x128xf32>
    %50 = arith.subf %46, %49 : vector<32x128xf32>
    %51 = math.exp %50 : vector<32x128xf32>
    %cst_21 = arith.constant dense<0.000000e+00> : vector<32xf32>
    %52 = vector.multi_reduction <add>, %51, %cst_21 [1] : vector<32x128xf32> to vector<32xf32>
    %53 = vector.shape_cast %52 : vector<32xf32> to vector<32x1xf32>
    %54 = tpu.reciprocal %53 {approx = true} : vector<32x1xf32> -> vector<32x1xf32>
    %55 = vector.broadcast %54 : vector<32x1xf32> to vector<32x128xf32>
    %56 = arith.mulf %51, %55 : vector<32x128xf32>
    %cst_22 = arith.constant dense<0.000000e+00> : vector<32x8xf32>
    %57 = tpu.matmul %56, %42, %cst_22 {dimension_numbers = #tpu.dot_dimension_numbers<[1], [0], [0], [1], [0, 0, 1, 1], [], []>} : vector<32x128xf32>, vector<128x8xf32>, vector<32x8xf32> -> vector<32x8xf32>
    %c8_23 = arith.constant 8 : index
    %c0_24 = arith.constant 0 : index
    %58 = vector.load %arg4[%c8_23, %c0_24] : memref<32x32xf32, #tpu.memory_space<vmem>>, vector<8x32xf32>
    %cst_25 = arith.constant dense<0.000000e+00> : vector<32x32xf32>
    %59 = tpu.matmul %57, %58, %cst_25 {dimension_numbers = #tpu.dot_dimension_numbers<[1], [0], [0], [1], [0, 0, 1, 1], [], []>} : vector<32x8xf32>, vector<8x32xf32>, vector<32x32xf32> -> vector<32x32xf32>
    %60 = arith.addf %33, %59 : vector<32x32xf32>
    %c0_26 = arith.constant 0 : index
    %61 = arith.index_cast %1 : i32 to index
    %c16 = arith.constant 16 : index
    %62 = vector.load %arg2[%c0_26, %61, %c16] : memref<1x256x96xf32, #tpu.memory_space<vmem>>, vector<1x32x8xf32>
    %63 = vector.shape_cast %62 : vector<1x32x8xf32> to vector<32x8xf32>
    %c0_27 = arith.constant 0 : index
    %64 = arith.index_cast %7 : i32 to index
    %c48 = arith.constant 48 : index
    %65 = vector.load %arg2[%c0_27, %64, %c48] : memref<1x256x96xf32, #tpu.memory_space<vmem>>, vector<1x128x8xf32>
    %66 = vector.shape_cast %65 : vector<1x128x8xf32> to vector<128x8xf32>
    %c0_28 = arith.constant 0 : index
    %67 = arith.index_cast %7 : i32 to index
    %c80 = arith.constant 80 : index
    %68 = vector.load %arg2[%c0_28, %67, %c80] : memref<1x256x96xf32, #tpu.memory_space<vmem>>, vector<1x128x8xf32>
    %69 = vector.shape_cast %68 : vector<1x128x8xf32> to vector<128x8xf32>
    %cst_29 = arith.constant dense<0.000000e+00> : vector<32x128xf32>
    %70 = tpu.matmul %63, %66, %cst_29 {dimension_numbers = #tpu.dot_dimension_numbers<[1], [1], [0], [0], [0, 0, 1, 0], [], []>} : vector<32x8xf32>, vector<128x8xf32>, vector<32x128xf32> -> vector<32x128xf32>
    %c0_30 = arith.constant 0 : index
    %c2 = arith.constant 2 : index
    %c0_31 = arith.constant 0 : index
    %c0_32 = arith.constant 0 : index
    %71 = vector.load %arg3[%c0_30, %c2, %c0_31, %c0_32] : memref<1x4x32x128xf32, #tpu.memory_space<vmem>>, vector<1x1x32x128xf32>
    %72 = vector.shape_cast %71 : vector<1x1x32x128xf32> to vector<32x128xf32>
    %73 = arith.addf %70, %72 : vector<32x128xf32>
    %cst_33 = arith.constant dense<0xFF800000> : vector<32xf32>
    %74 = vector.multi_reduction <maximumf>, %73, %cst_33 [1] : vector<32x128xf32> to vector<32xf32>
    %75 = vector.shape_cast %74 : vector<32xf32> to vector<32x1xf32>
    %76 = vector.broadcast %75 : vector<32x1xf32> to vector<32x128xf32>
    %77 = arith.subf %73, %76 : vector<32x128xf32>
    %78 = math.exp %77 : vector<32x128xf32>
    %cst_34 = arith.constant dense<0.000000e+00> : vector<32xf32>
    %79 = vector.multi_reduction <add>, %78, %cst_34 [1] : vector<32x128xf32> to vector<32xf32>
    %80 = vector.shape_cast %79 : vector<32xf32> to vector<32x1xf32>
    %81 = tpu.reciprocal %80 {approx = true} : vector<32x1xf32> -> vector<32x1xf32>
    %82 = vector.broadcast %81 : vector<32x1xf32> to vector<32x128xf32>
    %83 = arith.mulf %78, %82 : vector<32x128xf32>
    %cst_35 = arith.constant dense<0.000000e+00> : vector<32x8xf32>
    %84 = tpu.matmul %83, %69, %cst_35 {dimension_numbers = #tpu.dot_dimension_numbers<[1], [0], [0], [1], [0, 0, 1, 1], [], []>} : vector<32x128xf32>, vector<128x8xf32>, vector<32x8xf32> -> vector<32x8xf32>
    %c16_36 = arith.constant 16 : index
    %c0_37 = arith.constant 0 : index
    %85 = vector.load %arg4[%c16_36, %c0_37] : memref<32x32xf32, #tpu.memory_space<vmem>>, vector<8x32xf32>
    %cst_38 = arith.constant dense<0.000000e+00> : vector<32x32xf32>
    %86 = tpu.matmul %84, %85, %cst_38 {dimension_numbers = #tpu.dot_dimension_numbers<[1], [0], [0], [1], [0, 0, 1, 1], [], []>} : vector<32x8xf32>, vector<8x32xf32>, vector<32x32xf32> -> vector<32x32xf32>
    %87 = arith.addf %60, %86 : vector<32x32xf32>
    %c0_39 = arith.constant 0 : index
    %88 = arith.index_cast %1 : i32 to index
    %c24 = arith.constant 24 : index
    %89 = vector.load %arg2[%c0_39, %88, %c24] : memref<1x256x96xf32, #tpu.memory_space<vmem>>, vector<1x32x8xf32>
    %90 = vector.shape_cast %89 : vector<1x32x8xf32> to vector<32x8xf32>
    %c0_40 = arith.constant 0 : index
    %91 = arith.index_cast %7 : i32 to index
    %c56 = arith.constant 56 : index
    %92 = vector.load %arg2[%c0_40, %91, %c56] : memref<1x256x96xf32, #tpu.memory_space<vmem>>, vector<1x128x8xf32>
    %93 = vector.shape_cast %92 : vector<1x128x8xf32> to vector<128x8xf32>
    %c0_41 = arith.constant 0 : index
    %94 = arith.index_cast %7 : i32 to index
    %c88 = arith.constant 88 : index
    %95 = vector.load %arg2[%c0_41, %94, %c88] : memref<1x256x96xf32, #tpu.memory_space<vmem>>, vector<1x128x8xf32>
    %96 = vector.shape_cast %95 : vector<1x128x8xf32> to vector<128x8xf32>
    %cst_42 = arith.constant dense<0.000000e+00> : vector<32x128xf32>
    %97 = tpu.matmul %90, %93, %cst_42 {dimension_numbers = #tpu.dot_dimension_numbers<[1], [1], [0], [0], [0, 0, 1, 0], [], []>} : vector<32x8xf32>, vector<128x8xf32>, vector<32x128xf32> -> vector<32x128xf32>
    %c0_43 = arith.constant 0 : index
    %c3 = arith.constant 3 : index
    %c0_44 = arith.constant 0 : index
    %c0_45 = arith.constant 0 : index
    %98 = vector.load %arg3[%c0_43, %c3, %c0_44, %c0_45] : memref<1x4x32x128xf32, #tpu.memory_space<vmem>>, vector<1x1x32x128xf32>
    %99 = vector.shape_cast %98 : vector<1x1x32x128xf32> to vector<32x128xf32>
    %100 = arith.addf %97, %99 : vector<32x128xf32>
    %cst_46 = arith.constant dense<0xFF800000> : vector<32xf32>
    %101 = vector.multi_reduction <maximumf>, %100, %cst_46 [1] : vector<32x128xf32> to vector<32xf32>
    %102 = vector.shape_cast %101 : vector<32xf32> to vector<32x1xf32>
    %103 = vector.broadcast %102 : vector<32x1xf32> to vector<32x128xf32>
    %104 = arith.subf %100, %103 : vector<32x128xf32>
    %105 = math.exp %104 : vector<32x128xf32>
    %cst_47 = arith.constant dense<0.000000e+00> : vector<32xf32>
    %106 = vector.multi_reduction <add>, %105, %cst_47 [1] : vector<32x128xf32> to vector<32xf32>
    %107 = vector.shape_cast %106 : vector<32xf32> to vector<32x1xf32>
    %108 = tpu.reciprocal %107 {approx = true} : vector<32x1xf32> -> vector<32x1xf32>
    %109 = vector.broadcast %108 : vector<32x1xf32> to vector<32x128xf32>
    %110 = arith.mulf %105, %109 : vector<32x128xf32>
    %cst_48 = arith.constant dense<0.000000e+00> : vector<32x8xf32>
    %111 = tpu.matmul %110, %96, %cst_48 {dimension_numbers = #tpu.dot_dimension_numbers<[1], [0], [0], [1], [0, 0, 1, 1], [], []>} : vector<32x128xf32>, vector<128x8xf32>, vector<32x8xf32> -> vector<32x8xf32>
    %c24_49 = arith.constant 24 : index
    %c0_50 = arith.constant 0 : index
    %112 = vector.load %arg4[%c24_49, %c0_50] : memref<32x32xf32, #tpu.memory_space<vmem>>, vector<8x32xf32>
    %cst_51 = arith.constant dense<0.000000e+00> : vector<32x32xf32>
    %113 = tpu.matmul %111, %112, %cst_51 {dimension_numbers = #tpu.dot_dimension_numbers<[1], [0], [0], [1], [0, 0, 1, 1], [], []>} : vector<32x8xf32>, vector<8x32xf32>, vector<32x32xf32> -> vector<32x32xf32>
    %114 = arith.addf %87, %113 : vector<32x32xf32>
    %c0_52 = arith.constant 0 : index
    %c0_53 = arith.constant 0 : index
    %115 = vector.load %arg5[%c0_52, %c0_53] : memref<1x32xf32, #tpu.memory_space<vmem>>, vector<1x32xf32>
    %116 = vector.broadcast %115 : vector<1x32xf32> to vector<32x32xf32>
    %117 = arith.addf %114, %116 : vector<32x32xf32>
    %c0_54 = arith.constant 0 : index
    %c0_55 = arith.constant 0 : index
    %c0_56 = arith.constant 0 : index
    %118 = vector.load %arg6[%c0_54, %c0_55, %c0_56] : memref<1x32x32xf32, #tpu.memory_space<vmem>>, vector<1x32x32xf32>
    %119 = vector.shape_cast %118 : vector<1x32x32xf32> to vector<32x32xf32>
    %120 = vector.shape_cast %117 : vector<32x32xf32> to vector<1x32x32xf32>
    tpu.vector_store %arg6[%c0_54, %c0_55, %c0_56], %120 {strides = array<i32>} : memref<1x32x32xf32, #tpu.memory_space<vmem>>, vector<1x32x32xf32>,
    return
  }
  func.func @transform_0(%arg0: i32, %arg1: i32) -> (i32, i32, i32) {
    %c0_i32 = arith.constant 0 : i32
    %c0_i32_0 = arith.constant 0 : i32
    %c0_i32_1 = arith.constant 0 : i32
    return %arg0, %c0_i32, %c0_i32_0 : i32, i32, i32
  }
  func.func @transform_1(%arg0: i32, %arg1: i32) -> (i32, i32, i32, i32) {
    %c0_i32 = arith.constant 0 : i32
    %c0_i32_0 = arith.constant 0 : i32
    %c0_i32_1 = arith.constant 0 : i32
    %c0_i32_2 = arith.constant 0 : i32
    return %arg1, %c0_i32, %c0_i32_0, %c0_i32_1 : i32, i32, i32, i32
  }
  func.func @transform_2(%arg0: i32, %arg1: i32) -> (i32, i32) {
    %c0_i32 = arith.constant 0 : i32
    %c0_i32_0 = arith.constant 0 : i32
    %c0_i32_1 = arith.constant 0 : i32
    return %c0_i32, %c0_i32_0 : i32, i32
  }
  func.func @transform_3(%arg0: i32, %arg1: i32) -> (i32, i32) {
    %c0_i32 = arith.constant 0 : i32
    %c0_i32_0 = arith.constant 0 : i32
    %c0_i32_1 = arith.constant 0 : i32
    return %c0_i32, %c0_i32_0 : i32, i32
  }
  func.func @transform_4(%arg0: i32, %arg1: i32) -> (i32, i32, i32) {
    %c0_i32 = arith.constant 0 : i32
    %c0_i32_0 = arith.constant 0 : i32
    return %arg0, %arg1, %c0_i32 : i32, i32, i32
  }
}

</mosaic_0001>

<bundles_post_ra>
// kernel: neighborhood_attention_forward.2
= control target key start
LH: loop header
LB: loop body
LE: loop exit
PB: predicated region body
PF: predicated region fallthrough
CT: control target
= control target key end

     0   :  { %8 = vsyncpa [#allocation3], 0  ;;  %s1214_s0 = inlined_call_operand.hbm [shape: f32[512,32], index: 0, kind: input, shape index: {}]   ;;  %s1215_s1 = inlined_call_operand.vmem [shape: f32[32,96], index: 1, kind: input, shape index: {}]   ;;  %s1216_s2 = inlined_call_operand.vmem [shape: f32[1,96], index: 2, kind: input, shape index: {}]   ;;  %s1217_s3 = inlined_call_operand.vmem [shape: f32[512,96], index: 3, kind: output, shape index: {}]  }
   0x1   :  { %10 = vsyncpa [#allocation3 + $0x1], 0  ;;  %s933_s12 = smov 0   ;;  %s935_s13 = smov 0  }
   0x2   :  { %s937_s14 = smov 0   ;;  %s939_s15 = smov 0  }
   0x3 LB: > { %s658_s16 = sadd.s32 4294967295, %s908_s15   ;;  %s953_s17 = sadd.s32 1, %s908_s15   ;;  %s908_s15 = sphi %s939_s15, %s1226_s15   ;;  %s904_s14 = sphi %s937_s14, %s1225_s14   ;;  %s900_s13 = sphi %s935_s13, %s1224_s13   ;;  %s896_s12 = sphi %s933_s12, %s1223_s12  }
   0x4   : > { %s20_s18 = ssub.s32 %s908_s15, %s953_s17  ;;  %s23_s19 = sadd.s32 1, %s904_s14 }
   0x5   : > { %p21_p0 = scmp.eq.s32.totalorder %s20_s18, 0  ;;  %p30_p1 = scmp.ne.s32.totalorder %s904_s14, %s900_s13 }
   0x6   : > { %p31_p2 = scmp.eq.s32.totalorder %s908_s15, 0  ;;  %p36_p3 = scmp.ne.s32.totalorder %s900_s13, %s896_s12 }
   0x7   : > { %s963_s20 = scalar_select %p21_p0, %s904_s14, %s23_s19  }
   0x8   : > { %p32_p4 = por %p31_p2, %p30_p1  ;;  %p37_p5 = scmp.eq.s32.totalorder %s658_s16, 0 }
   0x9   : > { %p811_p6 = scmp.lt.s32.totalorder %s908_s15, 2  ;;  %s134_s22 = sand.u32 1, %s904_s14  }
   0xa   : > { %p968_p7 = por %p37_p5, %p36_p3  ;;  %s662_s23 = sshll.u32 %s134_s22, 8 }
   0xb   : > { %s704_s24 = sshll.u32 %s908_s15, 12  ;;  %s138_s28 = scalar_lea.vmem [#allocation2], %s662_s23 }
   0xc   : > { %s1219_s21 = scalar_select %p968_p7, 1, 0 }
   0xd   : > { %s977_s27 = scalar_lea.hbm %s1214_s0, %s704_s24  ;;  %s145_s29 = sshll.u32 %s138_s28, 4  ;;  %s979_s29 = int_to_ptr.vmem [resolvable:$true] %s145_s29 }
   0xe   : > { %p981_p8 = pnand %p811_p6, %p32_p4  ;;  %s986_s4 = scalar_lea.sflag [#allocation3], %s134_s22 }
   0xf   : > { %s846_s5 = scalar_lea.hbm %s977_s27, 4096  ;;  %s851_s8 = scalar_lea.hbm %s1214_s0, 8192 }
  0x10   : > { %p847_p10 = scmp.ne.s32.totalorder %s977_s27, %s846_s5  ;;  %p848_p11 = pneg %p981_p8 }
  0x11   : > { %p852_p0 = scmp.lt.s32.totalorder %s977_s27, %s1214_s0  ;;  %p853_p1 = scmp.lt.s32.totalorder %s851_s8, %s846_s5 }
  0x12   : > { %p849_p12 = pnand %p848_p11, %p847_p10 }
  0x13   : > { %p854_p2 = por %p853_p1, %p852_p0 }
  0x14   : > { %p850_p13 = pneg %p849_p12 }
  0x16   : > { %p855_p3 = pnand %p854_p2, %p850_p13 }
  0x18   : > { %858 = shalt.err (!%p855_p3)
}
  0x19   : > { %s859_s11 = scalar_lea.vmem %s979_s29, 4096  ;;  %s910_s12 = smov [#allocation2]  }
  0x1a   : > { %p860_p4 = scmp.ne.s32.totalorder %s979_s29, %s859_s11  ;;  %s864_s18 = sshll.u32 %s910_s12, 4  ;;  %s865_s18 = int_to_ptr.vmem [resolvable:$false] %s864_s18 }
  0x1b   : > { %s866_s19 = scalar_lea.vmem %s865_s18, 8192  ;;  %p867_p10 = scmp.lt.s32.totalorder %s979_s29, %s865_s18 }
  0x1c   : > { %p862_p5 = pnand %p860_p4, %p848_p11  ;;  %p868_p12 = scmp.lt.s32.totalorder %s866_s19, %s859_s11 }
  0x1e   : > { %p863_p6 = pneg %p862_p5  ;;  %p869_p9 = por %p868_p12, %p867_p10 }
  0x20   : > { %p870_p7 = pnand %p869_p9, %p863_p6 }
  0x22   : > { %873 = shalt.err (!%p870_p7)
}
  0x23   : > { %s911_s22 = smov 128   ;;  %s912_s23 = smov 8  }
  0x24   : > { %810 = dma.hbm_to_vmem [thread:$0]  (!%p981_p8), %s977_s27, 4096, %s979_s29, %s986_s4, %s911_s22, %s911_s22, %s912_s23  }
  0x25   : > { %p153_p11 = scmp.lt.s32.totalorder %s908_s15, 3  ;;  %p1221_p13 = scmp.ge.s32.totalorder %s908_s15, 1 }
  0x27   : > { %p154_p0 = pnand %p1221_p13, %p153_p11 }
  0x28   : > { %s159_s24 = sand.u32 (!%p154_p0), 1, %s900_s13   ;;  %p1222_p7 = scmp.ne.s32.totalorder (!%p154_p0), %s1219_s21, 0 }
  0x29   : > { %157 = sbr.rel (%p154_p0) target bundleno = 283 (0x11b), region = 32  ;;  %s666_s25 = sshll.u32 (!%p154_p0), %s159_s24, 8 }
  0x2a   : > { %s160_s26 = scalar_lea.sflag (!%p154_p0), [#allocation3], %s159_s24  ;;  %s1011_s28 = scalar_lea.vmem (!%p154_p0), [#allocation2], %s666_s25 }
  0x2e   : > { %891 = dma.done.wait (%p1222_p7), %s160_s26, 4096  }
  0x2f   : > { %893 = vsyncadd (%p1222_p7), %s160_s26, 4294963200  ;;  %v228_v0 = vld [vmem:[%s1215_s1 + $0x18] sm:$0xff]  ;;  %v227_v1 = vld [vmem:[%s1215_s1 + $0x10] sm:$0xff]  ;;  %vm236_vm0 = vcmask 261120   ;;  %s667_s8 = sshll.u32 %s658_s16, 5  ;;  %vm558_vm1 = vcmask 785408  }
  0x30   : > { %741 = vmatprep.subr.mxu0 %v228_v0  ;;  %797 = vmatprep.subr.mxu1 %v228_v0  ;;  %v226_v2 = vld [vmem:[%s1215_s1 + $0x8] sm:$0xff]  ;;  %v225_v3 = vld [vmem:[%s1215_s1] sm:$0xff]  ;;  %v195_v8 = vld [vmem:[%s1011_s28 + $0x10] sm:$0xff]  ;;  %p188_p8 = scmp.lt.s32.totalorder %s667_s8, 63 }
  0x31   : > { %742 = vmatpush3.msra.mxu0 %v228_v0  ;;  %801 = vmatpush3.msra.mxu1 %v228_v0  ;;  %v193_v4 = vld [vmem:[%s1011_s28] sm:$0xff]  ;;  %v194_v6 = vld [vmem:[%s1011_s28 + $0x8] sm:$0xff]  ;;  %v211_v9 = vld [vmem:[%s1011_s28 + $0x90] sm:$0xff] }
  0x32   : > { %743 = vmatprep.subr.mxu0 %v227_v1  ;;  %798 = vmatprep.subr.mxu1 %v227_v1  ;;  %v209_v5 = vld [vmem:[%s1011_s28 + $0x80] sm:$0xff]  ;;  %v210_v7 = vld [vmem:[%s1011_s28 + $0x88] sm:$0xff]  ;;  %v196_v10 = vld [vmem:[%s1011_s28 + $0x18] sm:$0xff]  ;;  %s1228_s8 = smov (!%p188_p8, %s667_s8), 63 }
  0x33   : > { %744 = vmatpush3.msra.mxu0 %v227_v1  ;;  %802 = vmatpush3.msra.mxu1 %v227_v1  ;;  %v212_v11 = vld [vmem:[%s1011_s28 + $0x98] sm:$0xff]  ;;  %v197_v12 = vld [vmem:[%s1011_s28 + $0x20] sm:$0xff]  ;;  %v198_v14 = vld [vmem:[%s1011_s28 + $0x28] sm:$0xff]  ;;  %s668_s9 = sshll.u32 %s1228_s8, 3 }
  0x34   : > { %745 = vmatprep.subr.mxu0 %v226_v2  ;;  %799 = vmatprep.subr.mxu1 %v226_v2  ;;  %v213_v13 = vld [vmem:[%s1011_s28 + $0xa0] sm:$0xff]  ;;  %v214_v15 = vld [vmem:[%s1011_s28 + $0xa8] sm:$0xff]  ;;  %v199_v16 = vld [vmem:[%s1011_s28 + $0x30] sm:$0xff]  ;;  %s1103_s19 = scalar_lea.vmem %s1217_s3, %s668_s9 }
  0x35   : > { %746 = vmatpush3.msra.mxu0 %v226_v2  ;;  %803 = vmatpush3.msra.mxu1 %v226_v2  ;;  %v215_v17 = vld [vmem:[%s1011_s28 + $0xb0] sm:$0xff]  ;;  %v200_v18 = vld [vmem:[%s1011_s28 + $0x38] sm:$0xff]  ;;  %v201_v20 = vld [vmem:[%s1011_s28 + $0x40] sm:$0xff] }
  0x36   : > { %747 = vmatprep.subr.mxu0 %v225_v3  ;;  %800 = vmatprep.subr.mxu1 %v225_v3  ;;  %v216_v19 = vld [vmem:[%s1011_s28 + $0xb8] sm:$0xff]  ;;  %v217_v21 = vld [vmem:[%s1011_s28 + $0xc0] sm:$0xff]  ;;  %v202_v22 = vld [vmem:[%s1011_s28 + $0x48] sm:$0xff] }
  0x37   : > { %748 = vmatpush3.msra.mxu0 %v225_v3  ;;  %804 = vmatpush3.msra.mxu1 %v225_v3  ;;  %v218_v23 = vld [vmem:[%s1011_s28 + $0xc8] sm:$0xff]  ;;  %v203_v24 = vld [vmem:[%s1011_s28 + $0x50] sm:$0xff]  ;;  %v204_v26 = vld [vmem:[%s1011_s28 + $0x58] sm:$0xff] }
  0x38   : > { %749 = vmatprep.mubr.msk.f32.mxu0 %vm236_vm0, %v193_v4  ;;  %773 = vmatprep.mubr.msk.f32.mxu1 %vm236_vm0, %v209_v5  ;;  %v219_v25 = vld [vmem:[%s1011_s28 + $0xd0] sm:$0xff]  ;;  %v220_v27 = vld [vmem:[%s1011_s28 + $0xd8] sm:$0xff]  ;;  %v205_v28 = vld [vmem:[%s1011_s28 + $0x60] sm:$0xff] }
  0x39   : > { %750 = vmatmul.mubr.msk.f32.vlgmr.msra.gmra.mxu0 %vm236_vm0, %v194_v6  ;;  %774 = vmatmul.mubr.msk.f32.vlgmr.msra.gmra.mxu1 %vm236_vm0, %v210_v7  ;;  %v221_v29 = vld [vmem:[%s1011_s28 + $0xe0] sm:$0xff]  ;;  %v206_v30 = vld [vmem:[%s1011_s28 + $0x68] sm:$0xff]  ;;  %v207_v32 = vld [vmem:[%s1011_s28 + $0x70] sm:$0xff] }
  0x3a   : > { %752 = vmatprep.mubr.msk.f32.mxu0 %vm236_vm0, %v195_v8  ;;  %776 = vmatprep.mubr.msk.f32.mxu1 %vm236_vm0, %v211_v9  ;;  %v222_v31 = vld [vmem:[%s1011_s28 + $0xe8] sm:$0xff]  ;;  %v223_v33 = vld [vmem:[%s1011_s28 + $0xf0] sm:$0xff]  ;;  %v208_v34 = vld [vmem:[%s1011_s28 + $0x78] sm:$0xff] }
  0x3b   : > { %v224_v35 = vld [vmem:[%s1011_s28 + $0xf8] sm:$0xff]  ;;  %v1098_v36 = vld [vmem:[%s1216_s2] ss:$0 sm:$0xff] }
  0x3d   : > { %753 = vmatmul.mubr.msk.f32.gmra.mxu0 %vm236_vm0, %v196_v10  ;;  %777 = vmatmul.mubr.msk.f32.gmra.mxu1 %vm236_vm0, %v212_v11 }
  0x3e   : > { %755 = vmatprep.mubr.msk.f32.mxu0 %vm236_vm0, %v197_v12  ;;  %779 = vmatprep.mubr.msk.f32.mxu1 %vm236_vm0, %v213_v13 }
  0x41   : > { %756 = vmatmul.mubr.msk.f32.gmra.mxu0 %vm236_vm0, %v198_v14  ;;  %780 = vmatmul.mubr.msk.f32.gmra.mxu1 %vm236_vm0, %v214_v15 }
  0x42   : > { %758 = vmatprep.mubr.msk.f32.mxu0 %vm236_vm0, %v199_v16  ;;  %782 = vmatprep.mubr.msk.f32.mxu1 %vm236_vm0, %v215_v17 }
  0x45   : > { %759 = vmatmul.mubr.msk.f32.gmra.mxu0 %vm236_vm0, %v200_v18  ;;  %783 = vmatmul.mubr.msk.f32.gmra.mxu1 %vm236_vm0, %v216_v19 }
  0x46   : > { %761 = vmatprep.mubr.msk.f32.mxu0 %vm236_vm0, %v201_v20  ;;  %785 = vmatprep.mubr.msk.f32.mxu1 %vm236_vm0, %v217_v21 }
  0x49   : > { %762 = vmatmul.mubr.msk.f32.gmra.mxu0 %vm236_vm0, %v202_v22  ;;  %786 = vmatmul.mubr.msk.f32.gmra.mxu1 %vm236_vm0, %v218_v23 }
  0x4a   : > { %764 = vmatprep.mubr.msk.f32.mxu0 %vm236_vm0, %v203_v24  ;;  %788 = vmatprep.mubr.msk.f32.mxu1 %vm236_vm0, %v219_v25 }
  0x4d   : > { %765 = vmatmul.mubr.msk.f32.gmra.mxu0 %vm236_vm0, %v204_v26  ;;  %789 = vmatmul.mubr.msk.f32.gmra.mxu1 %vm236_vm0, %v220_v27 }
  0x4e   : > { %767 = vmatprep.mubr.msk.f32.mxu0 %vm236_vm0, %v205_v28  ;;  %791 = vmatprep.mubr.msk.f32.mxu1 %vm236_vm0, %v221_v29 }
  0x51   : > { %768 = vmatmul.mubr.msk.f32.gmra.mxu0 %vm236_vm0, %v206_v30  ;;  %792 = vmatmul.mubr.msk.f32.gmra.mxu1 %vm236_vm0, %v222_v31 }
  0x52   : > { %770 = vmatprep.mubr.msk.f32.mxu0 %vm236_vm0, %v207_v32  ;;  %794 = vmatprep.mubr.msk.f32.mxu1 %vm236_vm0, %v223_v33 }
  0x55   : > { %771 = vmatmul.mubr.msk.f32.gmra.mxu0 %vm236_vm0, %v208_v34  ;;  %795 = vmatmul.mubr.msk.f32.gmra.mxu1 %vm236_vm0, %v224_v35 }
  0xf9   : > { %v751_v37 = vpop.f32.mrf.mxu0  ;;  %v775_v38 = vpop.f32.mrf.mxu1 }
  0xfa   : > { %v405_v39 = vadd.f32 %v751_v37, %v1098_v36  ;;  %v485_v40 = vadd.f32 %v775_v38, %v1098_v36 }
  0xfb   : > { %v399_v41 = vpop.f32.mrf.mxu0  ;;  %v479_v42 = vpop.f32.mrf.mxu1 }
  0xfc   : > { %560 = vst.msk [vmem:[%s1103_s19 + $0x8] sm:$0xff] %vm558_vm1, %v405_v39  ;;  %576 = vst.msk [vmem:[%s1103_s19 + $0x88] sm:$0xff] %vm558_vm1, %v485_v40  ;;  %v400_v43 = vadd.f32 %v1098_v36, %v399_v41  ;;  %v480_v44 = vadd.f32 %v1098_v36, %v479_v42 }
  0xfd   : > { %v754_v45 = vpop.f32.mrf.mxu0  ;;  %v778_v46 = vpop.f32.mrf.mxu1 }
  0xfe   : > { %559 = vst.msk [vmem:[%s1103_s19] sm:$0xff] %vm558_vm1, %v400_v43  ;;  %575 = vst.msk [vmem:[%s1103_s19 + $0x80] sm:$0xff] %vm558_vm1, %v480_v44  ;;  %v415_v47 = vadd.f32 %v754_v45, %v1098_v36  ;;  %v495_v48 = vadd.f32 %v778_v46, %v1098_v36 }
  0xff   : > { %v409_v49 = vpop.f32.mrf.mxu0  ;;  %v489_v50 = vpop.f32.mrf.mxu1 }
 0x100   : > { %562 = vst.msk [vmem:[%s1103_s19 + $0x18] sm:$0xff] %vm558_vm1, %v415_v47  ;;  %578 = vst.msk [vmem:[%s1103_s19 + $0x98] sm:$0xff] %vm558_vm1, %v495_v48  ;;  %v410_v51 = vadd.f32 %v1098_v36, %v409_v49  ;;  %v490_v52 = vadd.f32 %v1098_v36, %v489_v50 }
 0x101   : > { %v757_v53 = vpop.f32.mrf.mxu0  ;;  %v781_v54 = vpop.f32.mrf.mxu1 }
 0x102   : > { %561 = vst.msk [vmem:[%s1103_s19 + $0x10] sm:$0xff] %vm558_vm1, %v410_v51  ;;  %577 = vst.msk [vmem:[%s1103_s19 + $0x90] sm:$0xff] %vm558_vm1, %v490_v52  ;;  %v425_v55 = vadd.f32 %v757_v53, %v1098_v36  ;;  %v505_v56 = vadd.f32 %v781_v54, %v1098_v36 }
 0x103   : > { %v419_v57 = vpop.f32.mrf.mxu0  ;;  %v499_v58 = vpop.f32.mrf.mxu1 }
 0x104   : > { %564 = vst.msk [vmem:[%s1103_s19 + $0x28] sm:$0xff] %vm558_vm1, %v425_v55  ;;  %580 = vst.msk [vmem:[%s1103_s19 + $0xa8] sm:$0xff] %vm558_vm1, %v505_v56  ;;  %v420_v59 = vadd.f32 %v1098_v36, %v419_v57  ;;  %v500_v60 = vadd.f32 %v1098_v36, %v499_v58 }
 0x105   : > { %v760_v61 = vpop.f32.mrf.mxu0  ;;  %v784_v62 = vpop.f32.mrf.mxu1 }
 0x106   : > { %563 = vst.msk [vmem:[%s1103_s19 + $0x20] sm:$0xff] %vm558_vm1, %v420_v59  ;;  %579 = vst.msk [vmem:[%s1103_s19 + $0xa0] sm:$0xff] %vm558_vm1, %v500_v60  ;;  %v435_v63 = vadd.f32 %v760_v61, %v1098_v36  ;;  %v515_v0 = vadd.f32 %v784_v62, %v1098_v36 }
 0x107   : > { %v429_v1 = vpop.f32.mrf.mxu0  ;;  %v509_v2 = vpop.f32.mrf.mxu1 }
 0x108   : > { %566 = vst.msk [vmem:[%s1103_s19 + $0x38] sm:$0xff] %vm558_vm1, %v435_v63  ;;  %582 = vst.msk [vmem:[%s1103_s19 + $0xb8] sm:$0xff] %vm558_vm1, %v515_v0  ;;  %v430_v3 = vadd.f32 %v1098_v36, %v429_v1  ;;  %v510_v4 = vadd.f32 %v1098_v36, %v509_v2 }
 0x109   : > { %v763_v5 = vpop.f32.mrf.mxu0  ;;  %v787_v6 = vpop.f32.mrf.mxu1 }
 0x10a   : > { %565 = vst.msk [vmem:[%s1103_s19 + $0x30] sm:$0xff] %vm558_vm1, %v430_v3  ;;  %581 = vst.msk [vmem:[%s1103_s19 + $0xb0] sm:$0xff] %vm558_vm1, %v510_v4  ;;  %v445_v7 = vadd.f32 %v763_v5, %v1098_v36  ;;  %v525_v8 = vadd.f32 %v787_v6, %v1098_v36 }
 0x10b   : > { %v439_v9 = vpop.f32.mrf.mxu0  ;;  %v519_v10 = vpop.f32.mrf.mxu1 }
 0x10c   : > { %568 = vst.msk [vmem:[%s1103_s19 + $0x48] sm:$0xff] %vm558_vm1, %v445_v7  ;;  %584 = vst.msk [vmem:[%s1103_s19 + $0xc8] sm:$0xff] %vm558_vm1, %v525_v8  ;;  %v440_v11 = vadd.f32 %v1098_v36, %v439_v9  ;;  %v520_v12 = vadd.f32 %v1098_v36, %v519_v10 }
 0x10d   : > { %v766_v13 = vpop.f32.mrf.mxu0  ;;  %v790_v14 = vpop.f32.mrf.mxu1 }
 0x10e   : > { %567 = vst.msk [vmem:[%s1103_s19 + $0x40] sm:$0xff] %vm558_vm1, %v440_v11  ;;  %583 = vst.msk [vmem:[%s1103_s19 + $0xc0] sm:$0xff] %vm558_vm1, %v520_v12  ;;  %v455_v15 = vadd.f32 %v766_v13, %v1098_v36  ;;  %v535_v16 = vadd.f32 %v790_v14, %v1098_v36 }
 0x10f   : > { %v449_v17 = vpop.f32.mrf.mxu0  ;;  %v529_v18 = vpop.f32.mrf.mxu1 }
 0x110   : > { %570 = vst.msk [vmem:[%s1103_s19 + $0x58] sm:$0xff] %vm558_vm1, %v455_v15  ;;  %586 = vst.msk [vmem:[%s1103_s19 + $0xd8] sm:$0xff] %vm558_vm1, %v535_v16  ;;  %v450_v19 = vadd.f32 %v1098_v36, %v449_v17  ;;  %v530_v20 = vadd.f32 %v1098_v36, %v529_v18 }
 0x111   : > { %v769_v21 = vpop.f32.mrf.mxu0  ;;  %v793_v22 = vpop.f32.mrf.mxu1 }
 0x112   : > { %569 = vst.msk [vmem:[%s1103_s19 + $0x50] sm:$0xff] %vm558_vm1, %v450_v19  ;;  %585 = vst.msk [vmem:[%s1103_s19 + $0xd0] sm:$0xff] %vm558_vm1, %v530_v20  ;;  %v465_v23 = vadd.f32 %v769_v21, %v1098_v36  ;;  %v545_v24 = vadd.f32 %v793_v22, %v1098_v36 }
 0x113   : > { %v459_v25 = vpop.f32.mrf.mxu0  ;;  %v539_v26 = vpop.f32.mrf.mxu1 }
 0x114   : > { %572 = vst.msk [vmem:[%s1103_s19 + $0x68] sm:$0xff] %vm558_vm1, %v465_v23  ;;  %588 = vst.msk [vmem:[%s1103_s19 + $0xe8] sm:$0xff] %vm558_vm1, %v545_v24  ;;  %v460_v27 = vadd.f32 %v1098_v36, %v459_v25  ;;  %v540_v28 = vadd.f32 %v1098_v36, %v539_v26 }
 0x115   : > { %v772_v29 = vpop.f32.mrf.mxu0  ;;  %v796_v30 = vpop.f32.mrf.mxu1 }
 0x116   : > { %571 = vst.msk [vmem:[%s1103_s19 + $0x60] sm:$0xff] %vm558_vm1, %v460_v27  ;;  %587 = vst.msk [vmem:[%s1103_s19 + $0xe0] sm:$0xff] %vm558_vm1, %v540_v28  ;;  %v475_v31 = vadd.f32 %v772_v29, %v1098_v36  ;;  %v555_v32 = vadd.f32 %v796_v30, %v1098_v36 }
 0x117   : > { %v469_v33 = vpop.f32.mrf.mxu0  ;;  %v549_v34 = vpop.f32.mrf.mxu1 }
 0x118   : > { %574 = vst.msk [vmem:[%s1103_s19 + $0x78] sm:$0xff] %vm558_vm1, %v475_v31  ;;  %590 = vst.msk [vmem:[%s1103_s19 + $0xf8] sm:$0xff] %vm558_vm1, %v555_v32  ;;  %v470_v35 = vadd.f32 %v1098_v36, %v469_v33  ;;  %v550_v37 = vadd.f32 %v1098_v36, %v549_v34 }
 0x11a   : > { %573 = vst.msk [vmem:[%s1103_s19 + $0x70] sm:$0xff] %vm558_vm1, %v470_v35  ;;  %589 = vst.msk [vmem:[%s1103_s19 + $0xf0] sm:$0xff] %vm558_vm1, %v550_v37 }
 0x11b PF: > { %p13_p9 = scmp.ge.s32.totalorder %s953_s17, 4   ;;  %s1223_s12 = smov %s900_s13 }
 0x11c   : > { %s1224_s13 = smov %s904_s14  ;;  %s1225_s14 = smov %s963_s20 }
 0x11d   : > { %s1226_s15 = smov %s953_s17  ;;  %15 = sbr.rel (!%p13_p9) target bundleno = 3 (0x3), region = 72 }
 0x122   :  { %613 = vsyncpa [#allocation3], 1 }
 0x123   :  { %615 = vsyncpa [#allocation3 + $0x1], 1 }

// kernel: neighborhood_attention_forward.3
= control target key start
LH: loop header
LB: loop body
LE: loop exit
PB: predicated region body
PF: predicated region fallthrough
CT: control target
= control target key end

     0   :  { %9 = vsyncpa [#allocation3], 0  ;;  %s3865_s0 = inlined_call_operand.vmem [shape: f32[2,256,96], index: 0, kind: input, shape index: {}]   ;;  %s3866_s1 = inlined_call_operand.vmem [shape: f32[8,4,32,128], index: 1, kind: input, shape index: {}]   ;;  %s3867_s2 = inlined_call_operand.vmem [shape: f32[32,32], index: 2, kind: input, shape index: {}]   ;;  %s3868_s3 = inlined_call_operand.vmem [shape: f32[1,32], index: 3, kind: input, shape index: {}]   ;;  %s3869_s4 = inlined_call_operand.hbm [shape: f32[2,256,32], index: 4, kind: output, shape index: {}]  }
   0x1   :  { %11 = vsyncpa [#allocation3 + $0x1], 0  ;;  %s3108_s15 = smov 0   ;;  %s3110_s16 = smov 0  }
   0x2   :  { %s3112_s17 = smov 0   ;;  %s3114_s18 = smov 0  }
   0x3   :  { %s3116_s19 = smov 0   ;;  %s3118_s20 = smov 0  }
   0x4   :  { %s3120_s21 = smov 0   ;;  %s3122_s22 = smov 0  }
   0x5 LB: > { %s2153_s23 = sadd.s32 4294967295, %s3067_s22   ;;  %s2154_s24 = sadd.s32 4294967294, %s3067_s22   ;;  %s3067_s22 = sphi %s3122_s22, %s17_s22   ;;  %s3063_s21 = sphi %s3120_s21, %s3878_s21   ;;  %s3059_s20 = sphi %s3118_s20, %s3877_s20   ;;  %s3055_s19 = sphi %s3116_s19, %s3876_s19   ;;  %s3051_s18 = sphi %s3114_s18, %s3875_s18   ;;  %s3047_s17 = sphi %s3112_s17, %s3874_s17   ;;  %s3043_s16 = sphi %s3110_s16, %s3873_s16   ;;  %s3039_s15 = sphi %s3108_s15, %s3872_s15  }
   0x6   : > { %s26_s25 = sadd.s32 1, %s3059_s20  ;;  %s29_s26 = sadd.s32 1, %s3063_s21 }
   0x7   : > { %p27_p0 = scmp.ge.s32.totalorder %s26_s25, 8  ;;  %p142_p1 = scmp.ne.s32.totalorder %s3047_s17, %s3043_s16 }
   0x8   : > { %p143_p2 = scmp.eq.s32.totalorder %s2153_s23, 15  ;;  %p148_p5 = scmp.ne.s32.totalorder %s3043_s16, %s3039_s15 }
   0x9   : > { %s3880_s25 = smov (%p27_p0, %s26_s25), 0  ;;  %s3882_s26 = smov (!%p27_p0, %s29_s26), %s3063_s21 }
   0xa   : > { %s128_s27 = ssub.s32 %s3059_s20, %s3880_s25  ;;  %p3159_p3 = por %p143_p2, %p142_p1 }
   0xb   : > { %p31_p4 = scmp.ge.s32.totalorder %s3882_s26, 2  ;;  %p149_p6 = scmp.eq.s32.totalorder %s2154_s24, 15 }
   0xc   : > { %p2157_p7 = scmp.ge.s32.totalorder %s3067_s22, 1  ;;  %p189_p9 = scmp.lt.s32.totalorder %s3067_s22, 17 }
   0xd   : > { %s3884_s26 = smov (%p31_p4, %s3882_s26), 0  ;;  %p3168_p8 = por %p149_p6, %p148_p5 }
   0xe   : > { %s127_s30 = ssub.s32 %s3063_s21, %s3884_s26  ;;  %s132_s5 = sadd.s32 1, %s3047_s17 }
   0xf   : > { %s129_s6 = sor.u32 %s128_s27, %s127_s30  ;;  %p190_p10 = pnand %p2157_p7, %p189_p9 }
  0x10   : > { %p130_p11 = scmp.eq.s32.totalorder %s129_s6, 0  ;;  %p220_p12 = scmp.lt.s32.totalorder (!%p190_p10), %s3055_s19, 1 }
  0x11   : > { %193 = sbr.rel (%p190_p10) target bundleno = 3239 (0xca7), region = 36  ;;  %s2164_s8 = sshll.u32 (!%p190_p10), %s3051_s18, 1 }
  0x12   : > { %s3177_s7 = scalar_select %p130_p11, %s3047_s17, %s132_s5  }
  0x13   : > { %s2165_s9 = sadd.s32 (!%p190_p10), 4294967293, %s2164_s8  ;;  %s3069_s27 = smov (!%p190_p10), 96  }
  0x14   : > { %p234_p13 = scmp.gt.s32.totalorder (!%p190_p10), %s2165_s9, 0  ;;  %p2166_p0 = scmp.lt.s32.totalorder (!%p190_p10), %s2165_s9, 8 }
  0x15   : > { %s2163_s30 = sshll.u32 (!%p190_p10), %s3051_s18, 5  ;;  %s3070_s6 = smov (!%p190_p10), 64  }
  0x16   : > { %s221_s10 = scalar_select %p220_p12, %s3055_s19, 1  ;;  %vm313_vm0 = vcmask 64512   ;;  %vm2040_vm1 = vcmask 261120  }
  0x17   : > { %s3886_s9 = smov (!%p234_p13, %s2165_s9), 0  ;;  %s3071_s8 = smov 88  }
  0x18   : > { %s2287_s11 = sshll.u32 %s221_s10, 8  ;;  %s3888_s9 = smov (!%p2166_p0, %s3886_s9), 8 }
  0x19   : > { %s3185_s14 = scalar_lea.vmem %s3865_s0, %s2287_s11  ;;  %s2171_s23 = sshll.u32 %s3888_s9, 4 }
  0x1a   : > { %s3188_s24 = scalar_lea.vmem %s3185_s14, %s2171_s23  ;;  %s3256_s5 = scalar_lea.vmem %s3185_s14, %s2163_s30 }
  0x1b   : > { %v3191_v0 = vld [vmem:[%s3188_s24 + $0x78] sm:$0xff]  ;;  %v3194_v1 = vld [vmem:[%s3188_s24 + $0x68] sm:$0xff]  ;;  %v3199_v2 = vld [vmem:[%s3188_s24 + $0x70] sm:$0xff]  ;;  %p225_p1 = scmp.lt.s32.totalorder %s3051_s18, 7  ;;  %s3072_s14 = smov 120  }
  0x1c   : > { %311 = vrot.lane.b32.xlu0 %v3191_v0, %s3069_s27  ;;  %307 = vrot.lane.b32.xlu1 %v3194_v1, %s3069_s27  ;;  %v3202_v3 = vld [vmem:[%s3188_s24 + $0x60] sm:$0xff]  ;;  %v3207_v4 = vld [vmem:[%s3188_s24 + $0x58] sm:$0xff]  ;;  %s3073_s30 = smov 56   ;;  %s3076_s11 = smov 48  }
  0x1d   : > { %v3210_v5 = vld [vmem:[%s3188_s24 + $0x50] sm:$0xff]  ;;  %v3215_v6 = vld [vmem:[%s3188_s24 + $0x48] sm:$0xff]  ;;  %v3218_v7 = vld [vmem:[%s3188_s24 + $0x40] sm:$0xff]  ;;  %s226_s9 = scalar_select %p225_p1, %s3051_s18, 7 }
  0x1e   : > { %v3223_v8 = vld [vmem:[%s3188_s24 + $0x38] sm:$0xff]  ;;  %v3226_v9 = vld [vmem:[%s3188_s24 + $0x30] sm:$0xff]  ;;  %v3231_v10 = vld [vmem:[%s3188_s24 + $0x28] sm:$0xff]  ;;  %s3077_s12 = smov 72  }
  0x1f   : > { %v3234_v11 = vld [vmem:[%s3188_s24 + $0x20] sm:$0xff]  ;;  %v3239_v12 = vld [vmem:[%s3188_s24 + $0x18] sm:$0xff]  ;;  %v3242_v13 = vld [vmem:[%s3188_s24 + $0x10] sm:$0xff]  ;;  %s2288_s10 = sshll.u32 %s226_s9, 7 }
  0x20   : > { %309 = vrot.lane.b32.xlu0 %v3199_v2, %s3069_s27  ;;  %305 = vrot.lane.b32.xlu1 %v3202_v3, %s3069_s27  ;;  %v3247_v14 = vld [vmem:[%s3188_s24 + $0x8] sm:$0xff]  ;;  %v3250_v15 = vld [vmem:[%s3188_s24] sm:$0xff]  ;;  %s3347_s13 = scalar_lea.vmem %s3866_s1, %s2288_s10  ;;  %s2282_s10 = sshll.u32 %s3051_s18, 2 }
  0x21   : > { %v3259_v16 = vld [vmem:[%s3256_s5] sm:$0xff]  ;;  %v3328_v33 = vld [vmem:[%s3256_s5 + $0x8] sm:$0xff]  ;;  %v3331_v34 = vld [vmem:[%s3256_s5 + $0x10] sm:$0xff] }
  0x22   : > { %2503 = vmatprep.mubr.msk.f32.mxu0 %vm313_vm0, %v3259_v16  ;;  %v3338_v35 = vld [vmem:[%s3256_s5 + $0x18] sm:$0xff]  ;;  %v262_v45 = vld [vmem:[%s3347_s13 + $0x8] sm:$0xff]  ;;  %v261_v47 = vld [vmem:[%s3347_s13] sm:$0xff] }
  0x23   : > { %v264_v51 = vld [vmem:[%s3347_s13 + $0x18] sm:$0xff]  ;;  %v263_v55 = vld [vmem:[%s3347_s13 + $0x10] sm:$0xff] }
  0x24   : > { %303 = vrot.lane.b32.xlu0 %v3207_v4, %s3069_s27  ;;  %301 = vrot.lane.b32.xlu1 %v3210_v5, %s3069_s27 }
  0x28   : > { %299 = vrot.lane.b32.xlu0 %v3215_v6, %s3069_s27  ;;  %297 = vrot.lane.b32.xlu1 %v3218_v7, %s3069_s27 }
  0x2c   : > { %295 = vrot.lane.b32.xlu0 %v3223_v8, %s3069_s27  ;;  %293 = vrot.lane.b32.xlu1 %v3226_v9, %s3069_s27 }
  0x30   : > { %291 = vrot.lane.b32.xlu0 %v3231_v10, %s3069_s27  ;;  %289 = vrot.lane.b32.xlu1 %v3234_v11, %s3069_s27 }
  0x34   : > { %287 = vrot.lane.b32.xlu0 %v3239_v12, %s3069_s27  ;;  %285 = vrot.lane.b32.xlu1 %v3242_v13, %s3069_s27 }
  0x38   : > { %283 = vrot.lane.b32.xlu0 %v3247_v14, %s3069_s27  ;;  %281 = vrot.lane.b32.xlu1 %v3250_v15, %s3069_s27 }
  0x3c   : > { %509 = vrot.lane.b32.xlu1 %v3191_v0, %s3070_s6  ;;  %507 = vrot.lane.b32.xlu0 %v3199_v2, %s3070_s6 }
  0x40   : > { %503 = vrot.lane.b32.xlu1 %v3202_v3, %s3070_s6  ;;  %505 = vrot.lane.b32.xlu0 %v3194_v1, %s3070_s6 }
  0x44   : > { %499 = vrot.lane.b32.xlu1 %v3210_v5, %s3070_s6  ;;  %501 = vrot.lane.b32.xlu0 %v3207_v4, %s3070_s6 }
  0x48   : > { %497 = vrot.lane.b32.xlu1 %v3215_v6, %s3070_s6  ;;  %493 = vrot.lane.b32.xlu0 %v3223_v8, %s3070_s6 }
  0x4c   : > { %495 = vrot.lane.b32.xlu1 %v3218_v7, %s3070_s6  ;;  %489 = vrot.lane.b32.xlu0 %v3231_v10, %s3070_s6 }
  0x50   : > { %485 = vrot.lane.b32.xlu0 %v3239_v12, %s3070_s6 }
  0x54   : > { %481 = vrot.lane.b32.xlu0 %v3247_v14, %s3070_s6 }
  0x58   : > { %656 = vrot.lane.b32.xlu0 %v3191_v0, %s3071_s8 }
  0x5c   : > { %652 = vrot.lane.b32.xlu0 %v3194_v1, %s3071_s8 }
  0x60   : > { %648 = vrot.lane.b32.xlu0 %v3207_v4, %s3071_s8 }
  0x64   : > { %644 = vrot.lane.b32.xlu0 %v3215_v6, %s3071_s8 }
  0x8e   : > { %v312_v17 = vpop.permute.xlu0 %311  ;;  %v308_v18 = vpop.permute.xlu1 %307 }
  0x8f   : > { %2471 = vmatprep.subr.msk.mxu0 %vm313_vm0, %v312_v17 }
  0x90   : > { %2472 = vmatpush3.xpose.msk.msra.mxu0 %vm313_vm0, %v312_v17 }
  0x92   : > { %v310_v19 = vpop.permute.xlu0 %309  ;;  %v306_v20 = vpop.permute.xlu1 %305 }
  0x93   : > { %2473 = vmatprep.subr.msk.mxu0 %vm313_vm0, %v310_v19 }
  0x94   : > { %2474 = vmatpush3.xpose.msk.msra.mxu0 %vm313_vm0, %v310_v19 }
  0x95   : > { %2475 = vmatprep.subr.msk.mxu0 %vm313_vm0, %v308_v18 }
  0x96   : > { %v304_v21 = vpop.permute.xlu0 %303  ;;  %v302_v22 = vpop.permute.xlu1 %301 }
  0x98   : > { %2476 = vmatpush3.xpose.msk.msra.mxu0 %vm313_vm0, %v308_v18 }
  0x99   : > { %2477 = vmatprep.subr.msk.mxu0 %vm313_vm0, %v306_v20 }
  0x9a   : > { %v300_v23 = vpop.permute.xlu0 %299  ;;  %v298_v24 = vpop.permute.xlu1 %297 }
  0x9c   : > { %2478 = vmatpush3.xpose.msk.msra.mxu0 %vm313_vm0, %v306_v20 }
  0x9d   : > { %2479 = vmatprep.subr.msk.mxu0 %vm313_vm0, %v304_v21 }
  0x9e   : > { %v296_v25 = vpop.permute.xlu0 %295  ;;  %v294_v26 = vpop.permute.xlu1 %293 }
  0xa0   : > { %2480 = vmatpush3.xpose.msk.msra.mxu0 %vm313_vm0, %v304_v21 }
  0xa1   : > { %2481 = vmatprep.subr.msk.mxu0 %vm313_vm0, %v302_v22 }
  0xa2   : > { %v292_v27 = vpop.permute.xlu0 %291  ;;  %v290_v28 = vpop.permute.xlu1 %289 }
  0xa4   : > { %2482 = vmatpush3.xpose.msk.msra.mxu0 %vm313_vm0, %v302_v22 }
  0xa5   : > { %2483 = vmatprep.subr.msk.mxu0 %vm313_vm0, %v300_v23 }
  0xa6   : > { %v288_v29 = vpop.permute.xlu0 %287  ;;  %v286_v30 = vpop.permute.xlu1 %285 }
  0xa8   : > { %2484 = vmatpush3.xpose.msk.msra.mxu0 %vm313_vm0, %v300_v23 }
  0xa9   : > { %2485 = vmatprep.subr.msk.mxu0 %vm313_vm0, %v298_v24 }
  0xaa   : > { %v284_v31 = vpop.permute.xlu0 %283  ;;  %v282_v32 = vpop.permute.xlu1 %281 }
  0xac   : > { %2486 = vmatpush3.xpose.msk.msra.mxu0 %vm313_vm0, %v298_v24 }
  0xad   : > { %2487 = vmatprep.subr.msk.mxu0 %vm313_vm0, %v296_v25 }
  0xae   : > { %v510_v36 = vpop.permute.xlu1 %509  ;;  %v508_v37 = vpop.permute.xlu0 %507 }
  0xaf   : > { %2509 = vmatprep.subr.mxu1 %v510_v36 }
  0xb0   : > { %2488 = vmatpush3.xpose.msk.msra.mxu0 %vm313_vm0, %v296_v25  ;;  %2510 = vmatpush3.msra.mxu1 %v510_v36 }
  0xb1   : > { %2489 = vmatprep.subr.msk.mxu0 %vm313_vm0, %v294_v26  ;;  %2511 = vmatprep.subr.mxu1 %v508_v37 }
  0xb2   : > { %v504_v38 = vpop.permute.xlu1 %503  ;;  %2512 = vmatpush3.msra.mxu1 %v508_v37  ;;  %v506_v39 = vpop.permute.xlu0 %505 }
  0xb3   : > { %2513 = vmatprep.subr.mxu1 %v506_v39 }
  0xb4   : > { %2490 = vmatpush3.xpose.msk.msra.mxu0 %vm313_vm0, %v294_v26  ;;  %2514 = vmatpush3.msra.mxu1 %v506_v39 }
  0xb5   : > { %2491 = vmatprep.subr.msk.mxu0 %vm313_vm0, %v292_v27  ;;  %2515 = vmatprep.subr.mxu1 %v504_v38 }
  0xb6   : > { %v500_v40 = vpop.permute.xlu1 %499  ;;  %v502_v41 = vpop.permute.xlu0 %501  ;;  %2516 = vmatpush3.msra.mxu1 %v504_v38 }
  0xb7   : > { %2517 = vmatprep.subr.mxu1 %v502_v41 }
  0xb8   : > { %2492 = vmatpush3.xpose.msk.msra.mxu0 %vm313_vm0, %v292_v27  ;;  %2518 = vmatpush3.msra.mxu1 %v502_v41 }
  0xb9   : > { %2493 = vmatprep.subr.msk.mxu0 %vm313_vm0, %v290_v28  ;;  %2519 = vmatprep.subr.mxu1 %v500_v40 }
  0xba   : > { %v498_v42 = vpop.permute.xlu1 %497  ;;  %2520 = vmatpush3.msra.mxu1 %v500_v40  ;;  %v494_v44 = vpop.permute.xlu0 %493 }
  0xbb   : > { %2521 = vmatprep.subr.mxu1 %v498_v42 }
  0xbc   : > { %2494 = vmatpush3.xpose.msk.msra.mxu0 %vm313_vm0, %v290_v28  ;;  %2522 = vmatpush3.msra.mxu1 %v498_v42 }
  0xbd   : > { %2495 = vmatprep.subr.msk.mxu0 %vm313_vm0, %v288_v29 }
  0xbe   : > { %v496_v43 = vpop.permute.xlu1 %495  ;;  %v490_v57 = vpop.permute.xlu0 %489 }
  0xbf   : > { %2523 = vmatprep.subr.mxu1 %v496_v43 }
  0xc0   : > { %2496 = vmatpush3.xpose.msk.msra.mxu0 %vm313_vm0, %v288_v29  ;;  %2524 = vmatpush3.msra.mxu1 %v496_v43 }
  0xc1   : > { %2497 = vmatprep.subr.msk.mxu0 %vm313_vm0, %v286_v30  ;;  %2525 = vmatprep.subr.mxu1 %v494_v44 }
  0xc2   : > { %2526 = vmatpush3.msra.mxu1 %v494_v44  ;;  %v486_v58 = vpop.permute.xlu0 %485 }
  0xc4   : > { %2498 = vmatpush3.xpose.msk.msra.mxu0 %vm313_vm0, %v286_v30 }
  0xc5   : > { %2499 = vmatprep.subr.msk.mxu0 %vm313_vm0, %v284_v31 }
  0xc6   : > { %v482_v59 = vpop.permute.xlu0 %481 }
  0xc8   : > { %2500 = vmatpush3.xpose.msk.msra.mxu0 %vm313_vm0, %v284_v31 }
  0xc9   : > { %2501 = vmatprep.subr.msk.mxu0 %vm313_vm0, %v282_v32 }
  0xca   : > { %v3377_v60 = vpop.permute.xlu0 %656 }
  0xcc   : > { %2502 = vmatpush3.xpose.msk.msra.mxu0 %vm313_vm0, %v282_v32 }
  0xce   : > { %v3379_v61 = vpop.permute.xlu0 %652 }
  0xcf   : > { %2504 = vmatmul.mubr.msk.f32.vlgmr.msra.gmra.mxu0 %vm313_vm0, %v3328_v33 }
  0xd0   : > { %2506 = vmatprep.mubr.msk.f32.mxu0 %vm313_vm0, %v3331_v34 }
  0xd2   : > { %v3381_v62 = vpop.permute.xlu0 %648 }
  0xd3   : > { %2507 = vmatmul.mubr.msk.f32.gmra.mxu0 %vm313_vm0, %v3338_v35 }
  0xd6   : > { %v3383_v63 = vpop.permute.xlu0 %644 }
 0x18f   : > { %v2505_v46 = vpop.f32.mrf.mxu0 }
 0x190   : > { %v430_v48 = vadd.f32 %v2505_v46, %v262_v45 }
 0x191   : > { %v424_v49 = vpop.f32.mrf.mxu0 }
 0x192   : > { %v425_v50 = vadd.f32 %v424_v49, %v261_v47  ;;  %445 = vmax.xlane.f32.xlu1 %v430_v48 }
 0x193   : > { %v2508_v52 = vpop.f32.mrf.mxu0 }
 0x194   : > { %443 = vmax.xlane.f32.xlu0 %v425_v50  ;;  %v440_v53 = vadd.f32 %v2508_v52, %v264_v51 }
 0x195   : > { %v434_v54 = vpop.f32.mrf.mxu0 }
 0x196   : > { %v435_v56 = vadd.f32 %v434_v54, %v263_v55 }
 0x1a3   : > { %491 = vrot.lane.b32.xlu1 %v3226_v9, %s3070_s6 }
 0x1a7   : > { %487 = vrot.lane.b32.xlu1 %v3234_v11, %s3070_s6 }
 0x1aa   : > { %640 = vrot.lane.b32.xlu0 %v3223_v8, %s3071_s8 }
 0x1ab   : > { %483 = vrot.lane.b32.xlu1 %v3242_v13, %s3070_s6 }
 0x1af   : > { %479 = vrot.lane.b32.xlu1 %v3250_v15, %s3070_s6  ;;  %s3074_s6 = smov 80  }
 0x1b3   : > { %654 = vrot.lane.b32.xlu1 %v3199_v2, %s3071_s8 }
 0x1b7   : > { %650 = vrot.lane.b32.xlu1 %v3202_v3, %s3071_s8 }
 0x1bb   : > { %646 = vrot.lane.b32.xlu1 %v3210_v5, %s3071_s8 }
 0x1bf   : > { %642 = vrot.lane.b32.xlu1 %v3218_v7, %s3071_s8 }
 0x1c3   : > { %638 = vrot.lane.b32.xlu1 %v3226_v9, %s3071_s8 }
 0x1c7   : > { %634 = vrot.lane.b32.xlu1 %v3234_v11, %s3071_s8 }
 0x1c9   : > { %449 = vmax.xlane.f32.xlu0 %v440_v53 }
 0x1cd   : > { %447 = vmax.xlane.f32.xlu0 %v435_v56 }
 0x1e3   : > { %636 = vrot.lane.b32.xlu0 %v3231_v10, %s3071_s8 }
 0x21b   : > { %v446_v17 = vpop.xlane.xlu1 %445 }
 0x21c   : > { %v452_v18 = vsub.f32 %v430_v48, %v446_v17 }
 0x21d   : > { %v444_v19 = vpop.xlane.xlu0 %443 }
 0x21e   : > { %v457_v20 = vmul.f32 1.442695, %v452_v18  ;;  %v451_v21 = vsub.f32 %v425_v50, %v444_v19 }
 0x21f   : > { %v492_v22 = vpop.permute.xlu1 %491 }
 0x220   : > { %2891 = vpow2.f32 %v457_v20  ;;  %v455_v23 = vmul.f32 1.442695, %v451_v21  ;;  %2527 = vmatprep.subr.mxu1 %v492_v22  ;;  %v612_v21 = vld [vmem:[%s3867_s2] sm:$0xff] }
 0x221   : > { %2528 = vmatpush3.msra.mxu1 %v492_v22  ;;  %v641_v29 = vpop.permute.xlu0 %640 }
 0x222   : > { %2893 = vpow2.f32 %v455_v23  ;;  %2529 = vmatprep.subr.mxu1 %v490_v57 }
 0x223   : > { %2530 = vmatpush3.msra.mxu1 %v490_v57  ;;  %v488_v24 = vpop.permute.xlu1 %487 }
 0x224   : > { %2531 = vmatprep.subr.mxu1 %v488_v24 }
 0x225   : > { %2532 = vmatpush3.msra.mxu1 %v488_v24 }
 0x226   : > { %2533 = vmatprep.subr.mxu1 %v486_v58 }
 0x227   : > { %2534 = vmatpush3.msra.mxu1 %v486_v58  ;;  %v484_v25 = vpop.permute.xlu1 %483 }
 0x228   : > { %2535 = vmatprep.subr.mxu1 %v484_v25 }
 0x229   : > { %2536 = vmatpush3.msra.mxu1 %v484_v25 }
 0x22a   : > { %2537 = vmatprep.subr.mxu1 %v482_v59 }
 0x22b   : > { %2538 = vmatpush3.msra.mxu1 %v482_v59  ;;  %v480_v26 = vpop.permute.xlu1 %479 }
 0x22c   : > { %2539 = vmatprep.subr.mxu1 %v480_v26 }
 0x22d   : > { %v2892_v27 = vpop.eup %2891  ;;  %2540 = vmatpush3.msra.mxu1 %v480_v26  ;;  %v2193_v26 = vld [vmem:[%s3347_s13 + $0x28] sm:$0xff] }
 0x22e   : > { %2547 = vmatprep.subr.msk.mxu1 %vm313_vm0, %v3377_v60  ;;  %465 = vadd.xlane.f32.xlu0 %v2892_v27 }
 0x22f   : > { %v2894_v28 = vpop.eup %2893  ;;  %v655_v41 = vpop.permute.xlu1 %654 }
 0x230   : > { %463 = vadd.xlane.f32.xlu1 %v2894_v28 }
 0x233   : > { %v651_v42 = vpop.permute.xlu1 %650 }
 0x237   : > { %v647_v43 = vpop.permute.xlu1 %646 }
 0x23b   : > { %v643_v44 = vpop.permute.xlu1 %642 }
 0x23f   : > { %v639_v45 = vpop.permute.xlu1 %638 }
 0x241   : > { %630 = vrot.lane.b32.xlu1 %v3242_v13, %s3071_s8 }
 0x243   : > { %v635_v47 = vpop.permute.xlu1 %634 }
 0x244   : > { %632 = vrot.lane.b32.xlu0 %v3239_v12, %s3071_s8 }
 0x252   : > { %v450_v30 = vpop.xlane.xlu0 %449 }
 0x253   : > { %v454_v31 = vsub.f32 %v440_v53, %v450_v30 }
 0x255   : > { %v461_v32 = vmul.f32 1.442695, %v454_v31 }
 0x256   : > { %v448_v36 = vpop.xlane.xlu0 %447 }
 0x257   : > { %2895 = vpow2.f32 %v461_v32  ;;  %v453_v37 = vsub.f32 %v435_v56, %v448_v36  ;;  %v2195_v32 = vld [vmem:[%s3347_s13 + $0x38] sm:$0xff] }
 0x259   : > { %v459_v38 = vmul.f32 1.442695, %v453_v37 }
 0x25a   : > { %v637_v46 = vpop.permute.xlu0 %636 }
 0x25b   : > { %2897 = vpow2.f32 %v459_v38 }
 0x264   : > { %v3391_v39 = vpop.eup %2895 }
 0x265   : > { %469 = vadd.xlane.f32.xlu1 %v3391_v39 }
 0x268   : > { %v3394_v40 = vpop.eup %2897 }
 0x269   : > { %467 = vadd.xlane.f32.xlu0 %v3394_v40 }
 0x276   : > { %626 = vrot.lane.b32.xlu1 %v3250_v15, %s3071_s8 }
 0x27a   : > { %620 = vrot.lane.b32.xlu1 %v3328_v33, %s3072_s14 }
 0x27e   : > { %624 = vrot.lane.b32.xlu1 %v3338_v35, %s3072_s14 }
 0x27f   : > { %628 = vrot.lane.b32.xlu0 %v3247_v14, %s3071_s8  ;;  %s3075_s8 = smov 112  }
 0x283   : > { %618 = vrot.lane.b32.xlu0 %v3259_v16, %s3072_s14 }
 0x287   : > { %622 = vrot.lane.b32.xlu0 %v3331_v34, %s3072_s14 }
 0x28b   : > { %847 = vrot.lane.b32.xlu0 %v3199_v2, %s3073_s30 }
 0x28f   : > { %843 = vrot.lane.b32.xlu0 %v3202_v3, %s3073_s30 }
 0x293   : > { %837 = vrot.lane.b32.xlu0 %v3215_v6, %s3073_s30 }
 0x297   : > { %833 = vrot.lane.b32.xlu0 %v3223_v8, %s3073_s30 }
 0x2b7   : > { %v466_v48 = vpop.xlane.xlu0 %465 }
 0x2b8   : > { %2899 = vrcp.f32 %v466_v48 }
 0x2b9   : > { %v464_v49 = vpop.xlane.xlu1 %463 }
 0x2ba   : > { %2901 = vrcp.f32 %v464_v49 }
 0x2bb   : > { %v633_v55 = vpop.permute.xlu0 %632 }
 0x2bd   : > { %v631_v54 = vpop.permute.xlu1 %630 }
 0x2c5   : > { %v2900_v50 = vpop.eup %2899 }
 0x2c6   : > { %v476_v53 = vmul.f32 %v2900_v50, %v2892_v27 }
 0x2c7   : > { %v2902_v51 = vpop.eup %2901 }
 0x2c8   : > { %v475_v52 = vmul.f32 %v2902_v51, %v2894_v28  ;;  %v2192_v28 = vld [vmem:[%s3347_s13 + $0x20] sm:$0xff] }
 0x2ca   : > { %2541 = vmatprep.mubr.f32.mxu1 %v475_v52 }
 0x2cb   : > { %2542 = vmatmul.mubr.f32.vlgmr.msra.gmra.mxu1 %v476_v53 }
 0x2cc   : > { %2548 = vmatpush3.xpose.msk.msra.mxu1 %vm313_vm0, %v3377_v60 }
 0x2cd   : > { %2549 = vmatprep.subr.msk.mxu1 %vm313_vm0, %v655_v41 }
 0x2d0   : > { %2550 = vmatpush3.xpose.msk.msra.mxu1 %vm313_vm0, %v655_v41 }
 0x2d1   : > { %2551 = vmatprep.subr.msk.mxu1 %vm313_vm0, %v3379_v61 }
 0x2d4   : > { %2552 = vmatpush3.xpose.msk.msra.mxu1 %vm313_vm0, %v3379_v61 }
 0x2d5   : > { %2553 = vmatprep.subr.msk.mxu1 %vm313_vm0, %v651_v42 }
 0x2d8   : > { %2554 = vmatpush3.xpose.msk.msra.mxu1 %vm313_vm0, %v651_v42 }
 0x2d9   : > { %2555 = vmatprep.subr.msk.mxu1 %vm313_vm0, %v3381_v62 }
 0x2dc   : > { %2556 = vmatpush3.xpose.msk.msra.mxu1 %vm313_vm0, %v3381_v62 }
 0x2dd   : > { %2557 = vmatprep.subr.msk.mxu1 %vm313_vm0, %v647_v43 }
 0x2e0   : > { %2558 = vmatpush3.xpose.msk.msra.mxu1 %vm313_vm0, %v647_v43 }
 0x2e1   : > { %2559 = vmatprep.subr.msk.mxu1 %vm313_vm0, %v3383_v63 }
 0x2e4   : > { %2560 = vmatpush3.xpose.msk.msra.mxu1 %vm313_vm0, %v3383_v63 }
 0x2e5   : > { %2561 = vmatprep.subr.msk.mxu1 %vm313_vm0, %v643_v44 }
 0x2e8   : > { %2562 = vmatpush3.xpose.msk.msra.mxu1 %vm313_vm0, %v643_v44 }
 0x2e9   : > { %2563 = vmatprep.subr.msk.mxu1 %vm313_vm0, %v641_v29 }
 0x2ec   : > { %2564 = vmatpush3.xpose.msk.msra.mxu1 %vm313_vm0, %v641_v29 }
 0x2ed   : > { %2565 = vmatprep.subr.msk.mxu1 %vm313_vm0, %v639_v45 }
 0x2ee   : > { %v470_v56 = vpop.xlane.xlu1 %469 }
 0x2ef   : > { %2903 = vrcp.f32 %v470_v56 }
 0x2f0   : > { %2566 = vmatpush3.xpose.msk.msra.mxu1 %vm313_vm0, %v639_v45 }
 0x2f1   : > { %2567 = vmatprep.subr.msk.mxu1 %vm313_vm0, %v637_v46 }
 0x2f2   : > { %v468_v57 = vpop.xlane.xlu0 %467  ;;  %v627_v62 = vpop.permute.xlu1 %626 }
 0x2f3   : > { %2905 = vrcp.f32 %v468_v57 }
 0x2f4   : > { %2568 = vmatpush3.xpose.msk.msra.mxu1 %vm313_vm0, %v637_v46 }
 0x2f5   : > { %2569 = vmatprep.subr.msk.mxu1 %vm313_vm0, %v635_v47 }
 0x2f6   : > { %v629_v58 = vpop.permute.xlu0 %628  ;;  %v621_v18 = vpop.permute.xlu1 %620 }
 0x2f8   : > { %2570 = vmatpush3.xpose.msk.msra.mxu1 %vm313_vm0, %v635_v47 }
 0x2f9   : > { %2571 = vmatprep.subr.msk.mxu1 %vm313_vm0, %v633_v55 }
 0x2fa   : > { %v619_v17 = vpop.permute.xlu0 %618  ;;  %v625_v20 = vpop.permute.xlu1 %624 }
 0x2fc   : > { %2572 = vmatpush3.xpose.msk.msra.mxu1 %vm313_vm0, %v633_v55  ;;  %v2904_v59 = vpop.eup %2903 }
 0x2fd   : > { %2573 = vmatprep.subr.msk.mxu1 %vm313_vm0, %v631_v54  ;;  %v478_v63 = vmul.f32 %v2904_v59, %v3391_v39  ;;  %v2194_v39 = vld [vmem:[%s3347_s13 + $0x30] sm:$0xff] }
 0x2fe   : > { %v623_v19 = vpop.permute.xlu0 %622 }
 0x300   : > { %v2906_v60 = vpop.eup %2905  ;;  %2574 = vmatpush3.xpose.msk.msra.mxu1 %vm313_vm0, %v631_v54 }
 0x301   : > { %2575 = vmatprep.subr.msk.mxu1 %vm313_vm0, %v629_v58  ;;  %v477_v61 = vmul.f32 %v2906_v60, %v3394_v40 }
 0x302   : > { %v848_v41 = vpop.permute.xlu0 %847 }
 0x303   : > { %2544 = vmatprep.mubr.f32.mxu1 %v477_v61 }
 0x304   : > { %2576 = vmatpush3.xpose.msk.msra.mxu1 %vm313_vm0, %v629_v58 }
 0x305   : > { %2545 = vmatmul.mubr.f32.gmra.mxu1 %v478_v63  ;;  %2577 = vmatprep.subr.msk.mxu1 %vm313_vm0, %v627_v62 }
 0x306   : > { %2579 = vmatprep.mubr.msk.f32.mxu1 %vm313_vm0, %v619_v17  ;;  %v844_v42 = vpop.permute.xlu0 %843 }
 0x308   : > { %2578 = vmatpush3.xpose.msk.msra.mxu1 %vm313_vm0, %v627_v62 }
 0x309   : > { %2631 = vmatprep.subr.mxu1 %v612_v21 }
 0x30a   : > { %v838_v43 = vpop.permute.xlu0 %837 }
 0x30b   : > { %2580 = vmatmul.mubr.msk.f32.vlgmr.msra.gmra.mxu1 %vm313_vm0, %v621_v18 }
 0x30c   : > { %2582 = vmatprep.mubr.msk.f32.mxu1 %vm313_vm0, %v623_v19  ;;  %2632 = vmatpush3.msra.mxu1 %v612_v21 }
 0x30e   : > { %v834_v44 = vpop.permute.xlu0 %833 }
 0x30f   : > { %2583 = vmatmul.mubr.msk.f32.gmra.mxu1 %vm313_vm0, %v625_v20 }
 0x38b   : > { %v2543_v22 = vpop.f32.mrf.mxu1 }
 0x38d   : > { %v593_v23 = vpop.f32.mrf.mxu1 }
 0x38e   : > { %2633 = vmatprep.mubr.msk.f32.mxu1 %vm313_vm0, %v593_v23 }
 0x38f   : > { %2634 = vmatmul.mubr.msk.f32.vlgmr.msra.gmra.mxu1 %vm313_vm0, %v2543_v22 }
 0x3c5   : > { %v2546_v24 = vpop.f32.mrf.mxu1 }
 0x3c7   : > { %v603_v25 = vpop.f32.mrf.mxu1 }
 0x3c8   : > { %2636 = vmatprep.mubr.msk.f32.mxu1 %vm313_vm0, %v603_v25 }
 0x3c9   : > { %2637 = vmatmul.mubr.msk.f32.gmra.mxu1 %vm313_vm0, %v2546_v24 }
 0x3cb   : > { %v2581_v27 = vpop.f32.mrf.mxu1 }
 0x3cc   : > { %v770_v29 = vadd.f32 %v2581_v27, %v2193_v26 }
 0x3cd   : > { %v764_v30 = vpop.f32.mrf.mxu1 }
 0x3ce   : > { %v765_v31 = vadd.f32 %v2192_v28, %v764_v30  ;;  %785 = vmax.xlane.f32.xlu1 %v770_v29 }
 0x3cf   : > { %v2584_v36 = vpop.f32.mrf.mxu1 }
 0x3d0   : > { %783 = vmax.xlane.f32.xlu0 %v765_v31  ;;  %v780_v37 = vadd.f32 %v2584_v36, %v2195_v32 }
 0x3d1   : > { %v774_v38 = vpop.f32.mrf.mxu1 }
 0x3d2   : > { %v775_v40 = vadd.f32 %v2194_v39, %v774_v38 }
 0x3df   : > { %849 = vrot.lane.b32.xlu1 %v3191_v0, %s3073_s30 }
 0x3e3   : > { %845 = vrot.lane.b32.xlu1 %v3194_v1, %s3073_s30 }
 0x3e6   : > { %829 = vrot.lane.b32.xlu0 %v3231_v10, %s3073_s30 }
 0x3e7   : > { %841 = vrot.lane.b32.xlu1 %v3207_v4, %s3073_s30 }
 0x3eb   : > { %839 = vrot.lane.b32.xlu1 %v3210_v5, %s3073_s30 }
 0x3ef   : > { %835 = vrot.lane.b32.xlu1 %v3218_v7, %s3073_s30 }
 0x3f3   : > { %831 = vrot.lane.b32.xlu1 %v3226_v9, %s3073_s30 }
 0x3f7   : > { %827 = vrot.lane.b32.xlu1 %v3234_v11, %s3073_s30 }
 0x3fb   : > { %823 = vrot.lane.b32.xlu1 %v3242_v13, %s3073_s30 }
 0x405   : > { %789 = vmax.xlane.f32.xlu0 %v780_v37 }
 0x409   : > { %787 = vmax.xlane.f32.xlu0 %v775_v40 }
 0x41f   : > { %825 = vrot.lane.b32.xlu0 %v3239_v12, %s3073_s30 }
 0x457   : > { %v786_v45 = vpop.xlane.xlu1 %785 }
 0x458   : > { %v792_v46 = vsub.f32 %v770_v29, %v786_v45 }
 0x459   : > { %v784_v47 = vpop.xlane.xlu0 %783 }
 0x45a   : > { %v797_v48 = vmul.f32 1.442695, %v792_v46  ;;  %v791_v49 = vsub.f32 %v765_v31, %v784_v47  ;;  %v3564_v47 = vld [vmem:[%s3188_s24 + $0x70] sm:$0xff] }
 0x45b   : > { %v850_v50 = vpop.permute.xlu1 %849 }
 0x45c   : > { %2907 = vpow2.f32 %v797_v48  ;;  %v795_v51 = vmul.f32 1.442695, %v791_v49  ;;  %2585 = vmatprep.subr.mxu0 %v850_v50  ;;  %v3569_v48 = vld [vmem:[%s3188_s24 + $0x60] sm:$0xff]  ;;  %v3574_v49 = vld [vmem:[%s3188_s24 + $0x48] sm:$0xff] }
 0x45d   : > { %2586 = vmatpush3.msra.mxu0 %v850_v50  ;;  %v830_v59 = vpop.permute.xlu0 %829 }
 0x45e   : > { %2909 = vpow2.f32 %v795_v51  ;;  %2587 = vmatprep.subr.mxu0 %v848_v41 }
 0x45f   : > { %v846_v52 = vpop.permute.xlu1 %845  ;;  %2588 = vmatpush3.msra.mxu0 %v848_v41 }
 0x460   : > { %2589 = vmatprep.subr.mxu0 %v846_v52 }
 0x461   : > { %2590 = vmatpush3.msra.mxu0 %v846_v52 }
 0x462   : > { %2591 = vmatprep.subr.mxu0 %v844_v42 }
 0x463   : > { %v842_v53 = vpop.permute.xlu1 %841  ;;  %2592 = vmatpush3.msra.mxu0 %v844_v42 }
 0x464   : > { %2593 = vmatprep.subr.mxu0 %v842_v53 }
 0x465   : > { %2594 = vmatpush3.msra.mxu0 %v842_v53 }
 0x467   : > { %v840_v54 = vpop.permute.xlu1 %839 }
 0x468   : > { %2595 = vmatprep.subr.mxu0 %v840_v54 }
 0x469   : > { %v3488_v55 = vpop.eup %2907  ;;  %2596 = vmatpush3.msra.mxu0 %v840_v54  ;;  %v2225_v54 = vld [vmem:[%s3347_s13 + $0x48] sm:$0xff] }
 0x46a   : > { %805 = vadd.xlane.f32.xlu0 %v3488_v55  ;;  %2597 = vmatprep.subr.mxu0 %v838_v43 }
 0x46b   : > { %v3491_v56 = vpop.eup %2909  ;;  %v836_v57 = vpop.permute.xlu1 %835  ;;  %2598 = vmatpush3.msra.mxu0 %v838_v43 }
 0x46c   : > { %2599 = vmatprep.subr.mxu0 %v836_v57  ;;  %803 = vadd.xlane.f32.xlu1 %v3491_v56 }
 0x46d   : > { %2600 = vmatpush3.msra.mxu0 %v836_v57 }
 0x46e   : > { %2601 = vmatprep.subr.mxu0 %v834_v44 }
 0x46f   : > { %v832_v58 = vpop.permute.xlu1 %831  ;;  %2602 = vmatpush3.msra.mxu0 %v834_v44 }
 0x470   : > { %2603 = vmatprep.subr.mxu0 %v832_v58 }
 0x471   : > { %2604 = vmatpush3.msra.mxu0 %v832_v58 }
 0x472   : > { %2605 = vmatprep.subr.mxu0 %v830_v59 }
 0x473   : > { %2606 = vmatpush3.msra.mxu0 %v830_v59  ;;  %v828_v60 = vpop.permute.xlu1 %827 }
 0x474   : > { %2607 = vmatprep.subr.mxu0 %v828_v60 }
 0x475   : > { %2608 = vmatpush3.msra.mxu0 %v828_v60  ;;  %v3596_v60 = vld [vmem:[%s3188_s24 + $0x68] sm:$0xff] }
 0x477   : > { %v824_v21 = vpop.permute.xlu1 %823 }
 0x47d   : > { %819 = vrot.lane.b32.xlu1 %v3250_v15, %s3073_s30 }
 0x480   : > { %821 = vrot.lane.b32.xlu0 %v3247_v14, %s3073_s30  ;;  %s217_s30 = sand.u32 1, %s3043_s16  }
 0x48e   : > { %v790_v61 = vpop.xlane.xlu0 %789 }
 0x48f   : > { %v794_v62 = vsub.f32 %v780_v37, %v790_v61  ;;  %v3601_v61 = vld [vmem:[%s3188_s24 + $0x28] sm:$0xff] }
 0x491   : > { %v801_v63 = vmul.f32 1.442695, %v794_v62  ;;  %v3606_v62 = vld [vmem:[%s3188_s24 + $0x58] sm:$0xff] }
 0x492   : > { %v788_v17 = vpop.xlane.xlu0 %787 }
 0x493   : > { %2911 = vpow2.f32 %v801_v63  ;;  %v793_v18 = vsub.f32 %v775_v40, %v788_v17  ;;  %v3611_v63 = vld [vmem:[%s3188_s24 + $0x50] sm:$0xff]  ;;  %v3616_v17 = vld [vmem:[%s3188_s24 + $0x40] sm:$0xff] }
 0x495   : > { %v799_v19 = vmul.f32 1.442695, %v793_v18  ;;  %v3621_v18 = vld [vmem:[%s3188_s24 + $0x30] sm:$0xff] }
 0x496   : > { %v826_v20 = vpop.permute.xlu0 %825 }
 0x497   : > { %2913 = vpow2.f32 %v799_v19  ;;  %2609 = vmatprep.subr.mxu0 %v826_v20  ;;  %v3626_v19 = vld [vmem:[%s3188_s24 + $0x20] sm:$0xff] }
 0x498   : > { %2610 = vmatpush3.msra.mxu0 %v826_v20  ;;  %v3631_v20 = vld [vmem:[%s3188_s24 + $0x10] sm:$0xff] }
 0x499   : > { %2611 = vmatprep.subr.mxu0 %v824_v21 }
 0x49a   : > { %2612 = vmatpush3.msra.mxu0 %v824_v21  ;;  %v2227_v21 = vld [vmem:[%s3347_s13 + $0x58] sm:$0xff] }
 0x4a0   : > { %v2912_v22 = vpop.eup %2911 }
 0x4a1   : > { %809 = vadd.xlane.f32.xlu1 %v2912_v22 }
 0x4a4   : > { %v2914_v23 = vpop.eup %2913 }
 0x4a5   : > { %807 = vadd.xlane.f32.xlu0 %v2914_v23 }
 0x4b2   : > { %1188 = vrot.lane.b32.xlu1 %v3199_v2, %s3074_s6 }
 0x4b6   : > { %1184 = vrot.lane.b32.xlu1 %v3202_v3, %s3074_s6 }
 0x4ba   : > { %1180 = vrot.lane.b32.xlu1 %v3210_v5, %s3074_s6 }
 0x4bb   : > { %1190 = vrot.lane.b32.xlu0 %v3191_v0, %s3074_s6 }
 0x4be   : > { %1176 = vrot.lane.b32.xlu1 %v3218_v7, %s3074_s6 }
 0x4bf   : > { %1186 = vrot.lane.b32.xlu0 %v3194_v1, %s3074_s6 }
 0x4c2   : > { %1172 = vrot.lane.b32.xlu1 %v3226_v9, %s3074_s6 }
 0x4c3   : > { %1182 = vrot.lane.b32.xlu0 %v3207_v4, %s3074_s6  ;;  %v952_v4 = vld [vmem:[%s3867_s2 + $0x8] sm:$0xff] }
 0x4c6   : > { %1168 = vrot.lane.b32.xlu1 %v3234_v11, %s3074_s6 }
 0x4c7   : > { %1178 = vrot.lane.b32.xlu0 %v3215_v6, %s3074_s6 }
 0x4ca   : > { %1164 = vrot.lane.b32.xlu1 %v3242_v13, %s3074_s6 }
 0x4cb   : > { %1174 = vrot.lane.b32.xlu0 %v3223_v8, %s3074_s6 }
 0x4ce   : > { %1160 = vrot.lane.b32.xlu1 %v3250_v15, %s3074_s6 }
 0x4cf   : > { %1170 = vrot.lane.b32.xlu0 %v3231_v10, %s3074_s6 }
 0x4d2   : > { %1154 = vrot.lane.b32.xlu1 %v3328_v33, %s3075_s8 }
 0x4d3   : > { %1166 = vrot.lane.b32.xlu0 %v3239_v12, %s3074_s6 }
 0x4d6   : > { %1158 = vrot.lane.b32.xlu1 %v3338_v35, %s3075_s8 }
 0x4d7   : > { %1162 = vrot.lane.b32.xlu0 %v3247_v14, %s3074_s6  ;;  %s2158_s6 = sshll.u32 %s217_s30, 5 }
 0x4db   : > { %1152 = vrot.lane.b32.xlu0 %v3259_v16, %s3075_s8 }
 0x4df   : > { %1156 = vrot.lane.b32.xlu0 %v3331_v34, %s3075_s8 }
 0x4e3   : > { %1381 = vrot.lane.b32.xlu0 %v3564_v47, %s3076_s11 }
 0x4e7   : > { %1377 = vrot.lane.b32.xlu0 %v3569_v48, %s3076_s11 }
 0x4eb   : > { %1371 = vrot.lane.b32.xlu0 %v3574_v49, %s3076_s11 }
 0x4ef   : > { %1367 = vrot.lane.b32.xlu0 %v3223_v8, %s3076_s11  ;;  %v3591_v8 = vld [vmem:[%s3188_s24 + $0x78] sm:$0xff] }
 0x4f3   : > { %v806_v0 = vpop.xlane.xlu0 %805 }
 0x4f4   : > { %2915 = vrcp.f32 %v806_v0 }
 0x4f5   : > { %v804_v1 = vpop.xlane.xlu1 %803 }
 0x4f6   : > { %2917 = vrcp.f32 %v804_v1  ;;  %v2226_v1 = vld [vmem:[%s3347_s13 + $0x50] sm:$0xff] }
 0x4f7   : > { %v822_v2 = vpop.permute.xlu0 %821 }
 0x4f8   : > { %2613 = vmatprep.subr.mxu0 %v822_v2 }
 0x4f9   : > { %v820_v3 = vpop.permute.xlu1 %819  ;;  %2614 = vmatpush3.msra.mxu0 %v822_v2 }
 0x4fa   : > { %2615 = vmatprep.subr.mxu0 %v820_v3 }
 0x4fb   : > { %2616 = vmatpush3.msra.mxu0 %v820_v3  ;;  %v3638_v3 = vld [vmem:[%s3188_s24 + $0x18] sm:$0xff] }
 0x4fc   : > { %2623 = vmatprep.subr.mxu0 %v952_v4 }
 0x501   : > { %v2916_v5 = vpop.eup %2915 }
 0x502   : > { %v816_v9 = vmul.f32 %v2916_v5, %v3488_v55 }
 0x503   : > { %v2918_v6 = vpop.eup %2917 }
 0x504   : > { %v815_v7 = vmul.f32 %v2918_v6, %v3491_v56  ;;  %v2224_v56 = vld [vmem:[%s3347_s13 + $0x40] sm:$0xff] }
 0x506   : > { %2617 = vmatprep.mubr.f32.mxu0 %v815_v7 }
 0x507   : > { %2618 = vmatmul.mubr.f32.vlgmr.msra.gmra.mxu0 %v816_v9 }
 0x508   : > { %2624 = vmatpush3.msra.mxu0 %v952_v4 }
 0x52a   : > { %v810_v10 = vpop.xlane.xlu1 %809 }
 0x52b   : > { %2919 = vrcp.f32 %v810_v10 }
 0x52e   : > { %v808_v11 = vpop.xlane.xlu0 %807  ;;  %v1189_v35 = vpop.permute.xlu1 %1188 }
 0x52f   : > { %2921 = vrcp.f32 %v808_v11 }
 0x532   : > { %v1191_v16 = vpop.permute.xlu0 %1190  ;;  %v1185_v25 = vpop.permute.xlu1 %1184 }
 0x533   : > { %2639 = vmatprep.subr.msk.mxu0 %vm313_vm0, %v1191_v16 }
 0x536   : > { %v1187_v24 = vpop.permute.xlu0 %1186  ;;  %v1181_v27 = vpop.permute.xlu1 %1180 }
 0x538   : > { %v2920_v12 = vpop.eup %2919 }
 0x539   : > { %v818_v15 = vmul.f32 %v2920_v12, %v2912_v22 }
 0x53a   : > { %v1183_v26 = vpop.permute.xlu0 %1182  ;;  %v1177_v29 = vpop.permute.xlu1 %1176 }
 0x53c   : > { %v2922_v13 = vpop.eup %2921 }
 0x53d   : > { %v817_v14 = vmul.f32 %v2922_v13, %v2914_v23 }
 0x53e   : > { %v1179_v28 = vpop.permute.xlu0 %1178  ;;  %v1173_v31 = vpop.permute.xlu1 %1172 }
 0x53f   : > { %2620 = vmatprep.mubr.f32.mxu0 %v817_v14 }
 0x540   : > { %2621 = vmatmul.mubr.f32.gmra.mxu0 %v818_v15 }
 0x542   : > { %v1175_v30 = vpop.permute.xlu0 %1174  ;;  %v1169_v36 = vpop.permute.xlu1 %1168 }
 0x546   : > { %v1171_v32 = vpop.permute.xlu0 %1170  ;;  %v1165_v38 = vpop.permute.xlu1 %1164 }
 0x54a   : > { %v1167_v37 = vpop.permute.xlu0 %1166  ;;  %v1161_v42 = vpop.permute.xlu1 %1160 }
 0x54e   : > { %v1163_v39 = vpop.permute.xlu0 %1162  ;;  %v1155_v44 = vpop.permute.xlu1 %1154 }
 0x552   : > { %v1153_v43 = vpop.permute.xlu0 %1152  ;;  %v1159_v46 = vpop.permute.xlu1 %1158 }
 0x556   : > { %v1157_v45 = vpop.permute.xlu0 %1156 }
 0x55a   : > { %v1382_v4 = vpop.permute.xlu0 %1381 }
 0x55e   : > { %v1378_v5 = vpop.permute.xlu0 %1377 }
 0x562   : > { %v1372_v6 = vpop.permute.xlu0 %1371 }
 0x566   : > { %v1368_v7 = vpop.permute.xlu0 %1367 }
 0x5c7   : > { %v2619_v33 = vpop.f32.mrf.mxu0 }
 0x5c9   : > { %v933_v34 = vpop.f32.mrf.mxu0 }
 0x5ca   : > { %2625 = vmatprep.mubr.msk.f32.mxu0 %vm313_vm0, %v933_v34 }
 0x5cb   : > { %2626 = vmatmul.mubr.msk.f32.vlgmr.msra.gmra.mxu0 %vm313_vm0, %v2619_v33 }
 0x5cc   : > { %2640 = vmatpush3.xpose.msk.msra.mxu0 %vm313_vm0, %v1191_v16 }
 0x5cd   : > { %2641 = vmatprep.subr.msk.mxu0 %vm313_vm0, %v1189_v35 }
 0x5d0   : > { %2642 = vmatpush3.xpose.msk.msra.mxu0 %vm313_vm0, %v1189_v35 }
 0x5d1   : > { %2643 = vmatprep.subr.msk.mxu0 %vm313_vm0, %v1187_v24 }
 0x5d4   : > { %2644 = vmatpush3.xpose.msk.msra.mxu0 %vm313_vm0, %v1187_v24 }
 0x5d5   : > { %2645 = vmatprep.subr.msk.mxu0 %vm313_vm0, %v1185_v25 }
 0x5d8   : > { %2646 = vmatpush3.xpose.msk.msra.mxu0 %vm313_vm0, %v1185_v25 }
 0x5d9   : > { %2647 = vmatprep.subr.msk.mxu0 %vm313_vm0, %v1183_v26 }
 0x5dc   : > { %2648 = vmatpush3.xpose.msk.msra.mxu0 %vm313_vm0, %v1183_v26 }
 0x5dd   : > { %2649 = vmatprep.subr.msk.mxu0 %vm313_vm0, %v1181_v27 }
 0x5e0   : > { %2650 = vmatpush3.xpose.msk.msra.mxu0 %vm313_vm0, %v1181_v27 }
 0x5e1   : > { %2651 = vmatprep.subr.msk.mxu0 %vm313_vm0, %v1179_v28 }
 0x5e4   : > { %2652 = vmatpush3.xpose.msk.msra.mxu0 %vm313_vm0, %v1179_v28 }
 0x5e5   : > { %2653 = vmatprep.subr.msk.mxu0 %vm313_vm0, %v1177_v29 }
 0x5e8   : > { %2654 = vmatpush3.xpose.msk.msra.mxu0 %vm313_vm0, %v1177_v29  ;;  %v3649_v29 = vld [vmem:[%s3188_s24] sm:$0xff] }
 0x5e9   : > { %2655 = vmatprep.subr.msk.mxu0 %vm313_vm0, %v1175_v30 }
 0x5ec   : > { %2656 = vmatpush3.xpose.msk.msra.mxu0 %vm313_vm0, %v1175_v30  ;;  %v3654_v30 = vld [vmem:[%s3188_s24 + $0x8] sm:$0xff] }
 0x5ed   : > { %2657 = vmatprep.subr.msk.mxu0 %vm313_vm0, %v1173_v31 }
 0x5f0   : > { %2658 = vmatpush3.xpose.msk.msra.mxu0 %vm313_vm0, %v1173_v31 }
 0x5f1   : > { %2659 = vmatprep.subr.msk.mxu0 %vm313_vm0, %v1171_v32 }
 0x5f4   : > { %2660 = vmatpush3.xpose.msk.msra.mxu0 %vm313_vm0, %v1171_v32 }
 0x5f5   : > { %2661 = vmatprep.subr.msk.mxu0 %vm313_vm0, %v1169_v36 }
 0x5f8   : > { %2662 = vmatpush3.xpose.msk.msra.mxu0 %vm313_vm0, %v1169_v36 }
 0x5f9   : > { %2663 = vmatprep.subr.msk.mxu0 %vm313_vm0, %v1167_v37 }
 0x5fc   : > { %2664 = vmatpush3.xpose.msk.msra.mxu0 %vm313_vm0, %v1167_v37 }
 0x5fd   : > { %2665 = vmatprep.subr.msk.mxu0 %vm313_vm0, %v1165_v38 }
 0x600   : > { %2666 = vmatpush3.xpose.msk.msra.mxu0 %vm313_vm0, %v1165_v38  ;;  %v2622_v40 = vpop.f32.mrf.mxu0 }
 0x601   : > { %2667 = vmatprep.subr.msk.mxu0 %vm313_vm0, %v1163_v39 }
 0x602   : > { %v943_v41 = vpop.f32.mrf.mxu0 }
 0x603   : > { %2628 = vmatprep.mubr.msk.f32.mxu0 %vm313_vm0, %v943_v41 }
 0x604   : > { %2668 = vmatpush3.xpose.msk.msra.mxu0 %vm313_vm0, %v1163_v39 }
 0x605   : > { %2629 = vmatmul.mubr.msk.f32.gmra.mxu0 %vm313_vm0, %v2622_v40  ;;  %2669 = vmatprep.subr.msk.mxu0 %vm313_vm0, %v1161_v42 }
 0x606   : > { %2671 = vmatprep.mubr.msk.f32.mxu0 %vm313_vm0, %v1153_v43 }
 0x608   : > { %2670 = vmatpush3.xpose.msk.msra.mxu0 %vm313_vm0, %v1161_v42 }
 0x60b   : > { %2672 = vmatmul.mubr.msk.f32.vlgmr.msra.gmra.mxu0 %vm313_vm0, %v1155_v44  ;;  %v3667_v44 = vld [vmem:[%s3188_s24 + $0x38] sm:$0xff]  ;;  %s3078_s24 = smov 104  }
 0x60c   : > { %2674 = vmatprep.mubr.msk.f32.mxu0 %vm313_vm0, %v1157_v45  ;;  %v2971_v45 = vld [vmem:[%s3256_s5] sm:$0xff] }
 0x60f   : > { %2675 = vmatmul.mubr.msk.f32.gmra.mxu0 %vm313_vm0, %v1159_v46  ;;  %v2972_v46 = vld [vmem:[%s3256_s5 + $0x8] sm:$0xff] }
 0x68b   : > { %v3580_v50 = vpop.f32.mrf.mxu0 }
 0x68d   : > { %v3582_v51 = vpop.f32.mrf.mxu0 }
 0x6c5   : > { %v3584_v52 = vpop.f32.mrf.mxu0 }
 0x6c7   : > { %v3586_v53 = vpop.f32.mrf.mxu0 }
 0x6cb   : > { %v2673_v55 = vpop.f32.mrf.mxu0 }
 0x6cc   : > { %v1304_v57 = vadd.f32 %v2673_v55, %v2225_v54  ;;  %v2973_v54 = vld [vmem:[%s3256_s5 + $0x10] sm:$0xff]  ;;  %v2974_v55 = vld [vmem:[%s3256_s5 + $0x18] sm:$0xff]  ;;  %s3079_s5 = smov 40  }
 0x6cd   : > { %v1298_v58 = vpop.f32.mrf.mxu0 }
 0x6ce   : > { %v1299_v59 = vadd.f32 %v2224_v56, %v1298_v58  ;;  %1319 = vmax.xlane.f32.xlu1 %v1304_v57 }
 0x6cf   : > { %v2676_v22 = vpop.f32.mrf.mxu0 }
 0x6d0   : > { %1317 = vmax.xlane.f32.xlu0 %v1299_v59  ;;  %v1314_v23 = vadd.f32 %v2676_v22, %v2227_v21  ;;  %v1486_v21 = vld [vmem:[%s3867_s2 + $0x10] sm:$0xff] }
 0x6d1   : > { %v1308_v0 = vpop.f32.mrf.mxu0 }
 0x6d2   : > { %v1309_v2 = vadd.f32 %v2226_v1, %v1308_v0 }
 0x6df   : > { %1383 = vrot.lane.b32.xlu1 %v3591_v8, %s3076_s11 }
 0x6e3   : > { %1379 = vrot.lane.b32.xlu1 %v3596_v60, %s3076_s11 }
 0x6e6   : > { %1363 = vrot.lane.b32.xlu0 %v3601_v61, %s3076_s11 }
 0x6e7   : > { %1375 = vrot.lane.b32.xlu1 %v3606_v62, %s3076_s11 }
 0x6eb   : > { %1373 = vrot.lane.b32.xlu1 %v3611_v63, %s3076_s11 }
 0x6ef   : > { %1369 = vrot.lane.b32.xlu1 %v3616_v17, %s3076_s11 }
 0x6f3   : > { %1365 = vrot.lane.b32.xlu1 %v3621_v18, %s3076_s11 }
 0x6f7   : > { %1361 = vrot.lane.b32.xlu1 %v3626_v19, %s3076_s11 }
 0x6fb   : > { %1357 = vrot.lane.b32.xlu1 %v3631_v20, %s3076_s11 }
 0x705   : > { %1323 = vmax.xlane.f32.xlu0 %v1314_v23 }
 0x709   : > { %1321 = vmax.xlane.f32.xlu0 %v1309_v2 }
 0x71f   : > { %1359 = vrot.lane.b32.xlu0 %v3638_v3, %s3076_s11 }
 0x757   : > { %v1320_v9 = vpop.xlane.xlu1 %1319 }
 0x758   : > { %v1326_v10 = vsub.f32 %v1304_v57, %v1320_v9 }
 0x759   : > { %v1318_v11 = vpop.xlane.xlu0 %1317 }
 0x75a   : > { %v1331_v12 = vmul.f32 1.442695, %v1326_v10  ;;  %v1325_v13 = vsub.f32 %v1299_v59, %v1318_v11  ;;  %v3687_v11 = vpop.f32.mrf.mxu1 }
 0x75b   : > { %v1384_v14 = vpop.permute.xlu1 %1383 }
 0x75c   : > { %2923 = vpow2.f32 %v1331_v12  ;;  %v1329_v15 = vmul.f32 1.442695, %v1325_v13  ;;  %2677 = vmatprep.subr.mxu1 %v1384_v14  ;;  %v3689_v12 = vpop.f32.mrf.mxu1 }
 0x75d   : > { %2678 = vmatpush3.msra.mxu1 %v1384_v14  ;;  %v1364_v27 = vpop.permute.xlu0 %1363 }
 0x75e   : > { %2925 = vpow2.f32 %v1329_v15  ;;  %2679 = vmatprep.subr.mxu1 %v1382_v4  ;;  %v3691_v13 = vpop.f32.mrf.mxu1 }
 0x75f   : > { %v1380_v16 = vpop.permute.xlu1 %1379  ;;  %2680 = vmatpush3.msra.mxu1 %v1382_v4 }
 0x760   : > { %2681 = vmatprep.subr.mxu1 %v1380_v16  ;;  %v3693_v14 = vpop.f32.mrf.mxu1 }
 0x761   : > { %2682 = vmatpush3.msra.mxu1 %v1380_v16 }
 0x762   : > { %2683 = vmatprep.subr.mxu1 %v1378_v5 }
 0x763   : > { %v1376_v33 = vpop.permute.xlu1 %1375  ;;  %2684 = vmatpush3.msra.mxu1 %v1378_v5 }
 0x764   : > { %2685 = vmatprep.subr.mxu1 %v1376_v33 }
 0x765   : > { %2686 = vmatpush3.msra.mxu1 %v1376_v33 }
 0x767   : > { %v1374_v34 = vpop.permute.xlu1 %1373 }
 0x768   : > { %2687 = vmatprep.subr.mxu1 %v1374_v34 }
 0x769   : > { %v3642_v35 = vpop.eup %2923  ;;  %2688 = vmatpush3.msra.mxu1 %v1374_v34 }
 0x76a   : > { %1339 = vadd.xlane.f32.xlu0 %v3642_v35  ;;  %2689 = vmatprep.subr.mxu1 %v1372_v6 }
 0x76b   : > { %v3645_v24 = vpop.eup %2925  ;;  %v1370_v25 = vpop.permute.xlu1 %1369  ;;  %2690 = vmatpush3.msra.mxu1 %v1372_v6 }
 0x76c   : > { %2691 = vmatprep.subr.mxu1 %v1370_v25  ;;  %1337 = vadd.xlane.f32.xlu1 %v3645_v24 }
 0x76d   : > { %2692 = vmatpush3.msra.mxu1 %v1370_v25 }
 0x76e   : > { %2693 = vmatprep.subr.mxu1 %v1368_v7 }
 0x76f   : > { %v1366_v26 = vpop.permute.xlu1 %1365  ;;  %2694 = vmatpush3.msra.mxu1 %v1368_v7 }
 0x770   : > { %2695 = vmatprep.subr.mxu1 %v1366_v26 }
 0x771   : > { %2696 = vmatpush3.msra.mxu1 %v1366_v26 }
 0x772   : > { %2697 = vmatprep.subr.mxu1 %v1364_v27 }
 0x773   : > { %2698 = vmatpush3.msra.mxu1 %v1364_v27  ;;  %v1362_v28 = vpop.permute.xlu1 %1361 }
 0x774   : > { %2699 = vmatprep.subr.mxu1 %v1362_v28 }
 0x775   : > { %2700 = vmatpush3.msra.mxu1 %v1362_v28 }
 0x777   : > { %v1358_v41 = vpop.permute.xlu1 %1357 }
 0x77d   : > { %1353 = vrot.lane.b32.xlu1 %v3649_v29, %s3076_s11 }
 0x780   : > { %1355 = vrot.lane.b32.xlu0 %v3654_v30, %s3076_s11  ;;  %s2283_s11 = sshll.u32 %s3055_s19, 5 }
 0x78e   : > { %v1324_v31 = vpop.xlane.xlu0 %1323 }
 0x78f   : > { %v1328_v32 = vsub.f32 %v1314_v23, %v1324_v31 }
 0x791   : > { %v1335_v36 = vmul.f32 1.442695, %v1328_v32 }
 0x792   : > { %v1322_v37 = vpop.xlane.xlu0 %1321 }
 0x793   : > { %2927 = vpow2.f32 %v1335_v36  ;;  %v1327_v38 = vsub.f32 %v1309_v2, %v1322_v37 }
 0x795   : > { %v1333_v39 = vmul.f32 1.442695, %v1327_v38 }
 0x796   : > { %v1360_v40 = vpop.permute.xlu0 %1359 }
 0x797   : > { %2929 = vpow2.f32 %v1333_v39  ;;  %2701 = vmatprep.subr.mxu1 %v1360_v40 }
 0x798   : > { %2702 = vmatpush3.msra.mxu1 %v1360_v40 }
 0x799   : > { %2703 = vmatprep.subr.mxu1 %v1358_v41 }
 0x79a   : > { %2704 = vmatpush3.msra.mxu1 %v1358_v41 }
 0x7a0   : > { %v2928_v42 = vpop.eup %2927 }
 0x7a1   : > { %1343 = vadd.xlane.f32.xlu1 %v2928_v42 }
 0x7a4   : > { %v2930_v43 = vpop.eup %2929 }
 0x7a5   : > { %1341 = vadd.xlane.f32.xlu0 %v2930_v43 }
 0x7b2   : > { %1629 = vrot.lane.b32.xlu1 %v3564_v47, %s3077_s12 }
 0x7b6   : > { %1625 = vrot.lane.b32.xlu1 %v3569_v48, %s3077_s12 }
 0x7ba   : > { %1621 = vrot.lane.b32.xlu1 %v3611_v63, %s3077_s12 }
 0x7bb   : > { %1631 = vrot.lane.b32.xlu0 %v3591_v8, %s3077_s12 }
 0x7be   : > { %1617 = vrot.lane.b32.xlu1 %v3616_v17, %s3077_s12 }
 0x7bf   : > { %1627 = vrot.lane.b32.xlu0 %v3596_v60, %s3077_s12 }
 0x7c2   : > { %1613 = vrot.lane.b32.xlu1 %v3621_v18, %s3077_s12 }
 0x7c3   : > { %1623 = vrot.lane.b32.xlu0 %v3606_v62, %s3077_s12 }
 0x7c6   : > { %1609 = vrot.lane.b32.xlu1 %v3626_v19, %s3077_s12 }
 0x7c7   : > { %1619 = vrot.lane.b32.xlu0 %v3574_v49, %s3077_s12 }
 0x7ca   : > { %1605 = vrot.lane.b32.xlu1 %v3631_v20, %s3077_s12 }
 0x7cb   : > { %1615 = vrot.lane.b32.xlu0 %v3667_v44, %s3077_s12 }
 0x7ce   : > { %1601 = vrot.lane.b32.xlu1 %v3649_v29, %s3077_s12 }
 0x7cf   : > { %1611 = vrot.lane.b32.xlu0 %v3601_v61, %s3077_s12 }
 0x7d2   : > { %1595 = vrot.lane.b32.xlu1 %v2972_v46, %s3078_s24 }
 0x7d3   : > { %1607 = vrot.lane.b32.xlu0 %v3638_v3, %s3077_s12 }
 0x7d6   : > { %1599 = vrot.lane.b32.xlu1 %v2974_v55, %s3078_s24  ;;  %v1134_v55 = vadd.f32 %v3687_v11, %v3580_v50  ;;  %v2254_v11 = vld [vmem:[%s3347_s13 + $0x70] sm:$0xff] }
 0x7d7   : > { %1603 = vrot.lane.b32.xlu0 %v3654_v30, %s3077_s12  ;;  %s219_s12 = scalar_lea.vmem [#allocation2], %s2158_s6  ;;  %s3080_s6 = smov [#allocation2]  }
 0x7d8   : > { %s2061_s14 = sshll.u32 %s219_s12, 4  ;;  %s2979_s8 = sshll.u32 %s3080_s6, 4  ;;  %s3810_s14 = int_to_ptr.vmem [resolvable:$true] %s2061_s14  ;;  %s2980_s8 = int_to_ptr.vmem [resolvable:$false] %s2979_s8 }
 0x7d9   : > { %s2975_s27 = scalar_lea.vmem %s3810_s14, 512  ;;  %s2981_s9 = scalar_lea.vmem %s2980_s8, 1024 }
 0x7da   : > { %p2976_p2 = scmp.ne.s32.totalorder %s3810_s14, %s2975_s27  ;;  %p2982_p6 = scmp.lt.s32.totalorder %s3810_s14, %s2980_s8 }
 0x7db   : > { %1593 = vrot.lane.b32.xlu0 %v2971_v45, %s3078_s24  ;;  %p2983_p7 = scmp.lt.s32.totalorder %s2981_s9, %s2975_s27 }
 0x7dc   : > { %p2977_p4 = pnand %p2976_p2, %p3159_p3 }
 0x7dd   : > { %p2984_p9 = por %p2983_p7, %p2982_p6 }
 0x7de   : > { %p2978_p5 = pneg %p2977_p4 }
 0x7df   : > { %1597 = vrot.lane.b32.xlu0 %v2973_v54, %s3078_s24  ;;  %s2058_s24 = sadd.s32 %s2283_s11, %s2282_s10 }
 0x7e0   : > { %s2284_s23 = sshll.u32 %s2058_s24, 7  ;;  %p2985_p10 = pnand %p2984_p9, %p2978_p5 }
 0x7f3   : > { %v1340_v56 = vpop.xlane.xlu0 %1339 }
 0x7f4   : > { %2931 = vrcp.f32 %v1340_v56 }
 0x7f5   : > { %v1338_v57 = vpop.xlane.xlu1 %1337 }
 0x7f6   : > { %2933 = vrcp.f32 %v1338_v57  ;;  %v1129_v57 = vadd.f32 %v3689_v12, %v3582_v51  ;;  %v2253_v51 = vld [vmem:[%s3347_s13 + $0x68] sm:$0xff] }
 0x7f7   : > { %v1356_v58 = vpop.permute.xlu0 %1355 }
 0x7f8   : > { %2705 = vmatprep.subr.mxu1 %v1356_v58 }
 0x7f9   : > { %v1354_v59 = vpop.permute.xlu1 %1353  ;;  %2706 = vmatpush3.msra.mxu1 %v1356_v58 }
 0x7fa   : > { %2707 = vmatprep.subr.mxu1 %v1354_v59 }
 0x7fb   : > { %2708 = vmatpush3.msra.mxu1 %v1354_v59 }
 0x7fc   : > { %2715 = vmatprep.subr.mxu1 %v1486_v21 }
 0x801   : > { %v2932_v22 = vpop.eup %2931 }
 0x802   : > { %v1350_v1 = vmul.f32 %v2932_v22, %v3642_v35  ;;  %v1144_v22 = vadd.f32 %v3691_v13, %v3584_v52  ;;  %v2255_v13 = vld [vmem:[%s3347_s13 + $0x78] sm:$0xff] }
 0x803   : > { %v2934_v23 = vpop.eup %2933 }
 0x804   : > { %v1349_v0 = vmul.f32 %v2934_v23, %v3645_v24 }
 0x806   : > { %2709 = vmatprep.mubr.f32.mxu1 %v1349_v0  ;;  %v1139_v0 = vadd.f32 %v3693_v14, %v3586_v53 }
 0x807   : > { %2710 = vmatmul.mubr.f32.vlgmr.msra.gmra.mxu1 %v1350_v1 }
 0x808   : > { %2716 = vmatpush3.msra.mxu1 %v1486_v21 }
 0x82a   : > { %v1344_v2 = vpop.xlane.xlu1 %1343 }
 0x82b   : > { %2935 = vrcp.f32 %v1344_v2 }
 0x82e   : > { %v1342_v4 = vpop.xlane.xlu0 %1341  ;;  %v1630_v33 = vpop.permute.xlu1 %1629 }
 0x82f   : > { %2937 = vrcp.f32 %v1342_v4 }
 0x832   : > { %v1632_v10 = vpop.permute.xlu0 %1631  ;;  %v1626_v35 = vpop.permute.xlu1 %1625 }
 0x833   : > { %2723 = vmatprep.subr.msk.mxu1 %vm313_vm0, %v1632_v10 }
 0x836   : > { %v1628_v34 = vpop.permute.xlu0 %1627  ;;  %v1622_v25 = vpop.permute.xlu1 %1621 }
 0x838   : > { %v2936_v5 = vpop.eup %2935 }
 0x839   : > { %v1352_v9 = vmul.f32 %v2936_v5, %v2928_v42  ;;  %v2252_v5 = vld [vmem:[%s3347_s13 + $0x60] sm:$0xff]  ;;  %s3814_s13 = scalar_lea.sflag [#allocation3], %s217_s30 }
 0x83a   : > { %v1624_v24 = vpop.permute.xlu0 %1623  ;;  %v1618_v27 = vpop.permute.xlu1 %1617 }
 0x83c   : > { %v2938_v6 = vpop.eup %2937 }
 0x83d   : > { %v1351_v7 = vmul.f32 %v2938_v6, %v2930_v43 }
 0x83e   : > { %v1620_v26 = vpop.permute.xlu0 %1619  ;;  %v1614_v31 = vpop.permute.xlu1 %1613 }
 0x83f   : > { %2712 = vmatprep.mubr.f32.mxu1 %v1351_v7 }
 0x840   : > { %2713 = vmatmul.mubr.f32.gmra.mxu1 %v1352_v9 }
 0x842   : > { %v1616_v28 = vpop.permute.xlu0 %1615  ;;  %v1610_v36 = vpop.permute.xlu1 %1609 }
 0x846   : > { %v1612_v32 = vpop.permute.xlu0 %1611  ;;  %v1606_v38 = vpop.permute.xlu1 %1605 }
 0x84a   : > { %v1608_v37 = vpop.permute.xlu0 %1607  ;;  %v1602_v41 = vpop.permute.xlu1 %1601 }
 0x84e   : > { %v1604_v39 = vpop.permute.xlu0 %1603  ;;  %v1596_v45 = vpop.permute.xlu1 %1595 }
 0x852   : > { %v1594_v43 = vpop.permute.xlu0 %1593  ;;  %v1600_v54 = vpop.permute.xlu1 %1599 }
 0x856   : > { %v1598_v46 = vpop.permute.xlu0 %1597 }
 0x8c7   : > { %v2711_v15 = vpop.f32.mrf.mxu1 }
 0x8c9   : > { %v1467_v16 = vpop.f32.mrf.mxu1 }
 0x8ca   : > { %2717 = vmatprep.mubr.msk.f32.mxu1 %vm313_vm0, %v1467_v16 }
 0x8cb   : > { %2718 = vmatmul.mubr.msk.f32.vlgmr.msra.gmra.mxu1 %vm313_vm0, %v2711_v15 }
 0x8cc   : > { %2724 = vmatpush3.xpose.msk.msra.mxu1 %vm313_vm0, %v1632_v10 }
 0x8cd   : > { %2725 = vmatprep.subr.msk.mxu1 %vm313_vm0, %v1630_v33 }
 0x8d0   : > { %2726 = vmatpush3.xpose.msk.msra.mxu1 %vm313_vm0, %v1630_v33 }
 0x8d1   : > { %2727 = vmatprep.subr.msk.mxu1 %vm313_vm0, %v1628_v34 }
 0x8d4   : > { %2728 = vmatpush3.xpose.msk.msra.mxu1 %vm313_vm0, %v1628_v34 }
 0x8d5   : > { %2729 = vmatprep.subr.msk.mxu1 %vm313_vm0, %v1626_v35 }
 0x8d8   : > { %2730 = vmatpush3.xpose.msk.msra.mxu1 %vm313_vm0, %v1626_v35 }
 0x8d9   : > { %2731 = vmatprep.subr.msk.mxu1 %vm313_vm0, %v1624_v24 }
 0x8dc   : > { %2732 = vmatpush3.xpose.msk.msra.mxu1 %vm313_vm0, %v1624_v24 }
 0x8dd   : > { %2733 = vmatprep.subr.msk.mxu1 %vm313_vm0, %v1622_v25 }
 0x8e0   : > { %2734 = vmatpush3.xpose.msk.msra.mxu1 %vm313_vm0, %v1622_v25 }
 0x8e1   : > { %2735 = vmatprep.subr.msk.mxu1 %vm313_vm0, %v1620_v26 }
 0x8e4   : > { %2736 = vmatpush3.xpose.msk.msra.mxu1 %vm313_vm0, %v1620_v26 }
 0x8e5   : > { %2737 = vmatprep.subr.msk.mxu1 %vm313_vm0, %v1618_v27 }
 0x8e8   : > { %2738 = vmatpush3.xpose.msk.msra.mxu1 %vm313_vm0, %v1618_v27 }
 0x8e9   : > { %2739 = vmatprep.subr.msk.mxu1 %vm313_vm0, %v1616_v28 }
 0x8ec   : > { %2740 = vmatpush3.xpose.msk.msra.mxu1 %vm313_vm0, %v1616_v28 }
 0x8ed   : > { %2741 = vmatprep.subr.msk.mxu1 %vm313_vm0, %v1614_v31 }
 0x8f0   : > { %2742 = vmatpush3.xpose.msk.msra.mxu1 %vm313_vm0, %v1614_v31 }
 0x8f1   : > { %2743 = vmatprep.subr.msk.mxu1 %vm313_vm0, %v1612_v32 }
 0x8f4   : > { %2744 = vmatpush3.xpose.msk.msra.mxu1 %vm313_vm0, %v1612_v32 }
 0x8f5   : > { %2745 = vmatprep.subr.msk.mxu1 %vm313_vm0, %v1610_v36 }
 0x8f8   : > { %2746 = vmatpush3.xpose.msk.msra.mxu1 %vm313_vm0, %v1610_v36 }
 0x8f9   : > { %2747 = vmatprep.subr.msk.mxu1 %vm313_vm0, %v1608_v37 }
 0x8fc   : > { %2748 = vmatpush3.xpose.msk.msra.mxu1 %vm313_vm0, %v1608_v37 }
 0x8fd   : > { %2749 = vmatprep.subr.msk.mxu1 %vm313_vm0, %v1606_v38 }
 0x900   : > { %2750 = vmatpush3.xpose.msk.msra.mxu1 %vm313_vm0, %v1606_v38  ;;  %v2714_v40 = vpop.f32.mrf.mxu1 }
 0x901   : > { %2751 = vmatprep.subr.msk.mxu1 %vm313_vm0, %v1604_v39 }
 0x902   : > { %v1477_v42 = vpop.f32.mrf.mxu1 }
 0x903   : > { %2720 = vmatprep.mubr.msk.f32.mxu1 %vm313_vm0, %v1477_v42 }
 0x904   : > { %2752 = vmatpush3.xpose.msk.msra.mxu1 %vm313_vm0, %v1604_v39 }
 0x905   : > { %2721 = vmatmul.mubr.msk.f32.gmra.mxu1 %vm313_vm0, %v2714_v40  ;;  %2753 = vmatprep.subr.msk.mxu1 %vm313_vm0, %v1602_v41 }
 0x906   : > { %2755 = vmatprep.mubr.msk.f32.mxu1 %vm313_vm0, %v1594_v43 }
 0x908   : > { %2754 = vmatpush3.xpose.msk.msra.mxu1 %vm313_vm0, %v1602_v41 }
 0x90b   : > { %2756 = vmatmul.mubr.msk.f32.vlgmr.msra.gmra.mxu1 %vm313_vm0, %v1596_v45 }
 0x90c   : > { %2758 = vmatprep.mubr.msk.f32.mxu1 %vm313_vm0, %v1598_v46 }
 0x90f   : > { %2759 = vmatmul.mubr.msk.f32.gmra.mxu1 %vm313_vm0, %v1600_v54 }
 0x98b   : > { %v2719_v56 = vpop.f32.mrf.mxu1 }
 0x98c   : > { %v3738_v58 = vadd.f32 %v2719_v56, %v1134_v55 }
 0x98d   : > { %v1565_v59 = vpop.f32.mrf.mxu1 }
 0x98e   : > { %v3740_v21 = vadd.f32 %v1565_v59, %v1129_v57 }
 0x9c5   : > { %v2722_v23 = vpop.f32.mrf.mxu1 }
 0x9c6   : > { %v3746_v1 = vadd.f32 %v2722_v23, %v1144_v22 }
 0x9c7   : > { %v1575_v50 = vpop.f32.mrf.mxu1 }
 0x9c8   : > { %v3748_v2 = vadd.f32 %v1575_v50, %v1139_v0 }
 0x9cb   : > { %v2757_v4 = vpop.f32.mrf.mxu1 }
 0x9cc   : > { %v1745_v6 = vadd.f32 %v2757_v4, %v2253_v51 }
 0x9cd   : > { %v1739_v7 = vpop.f32.mrf.mxu1 }
 0x9ce   : > { %v1740_v9 = vadd.f32 %v2252_v5, %v1739_v7  ;;  %1760 = vmax.xlane.f32.xlu1 %v1745_v6  ;;  %v2280_v5 = vld [vmem:[%s3868_s3] ss:$0 sm:$0xff] }
 0x9cf   : > { %v2760_v10 = vpop.f32.mrf.mxu1 }
 0x9d0   : > { %1758 = vmax.xlane.f32.xlu0 %v1740_v9  ;;  %v1755_v53 = vadd.f32 %v2760_v10, %v2255_v13 }
 0x9d1   : > { %v1749_v52 = vpop.f32.mrf.mxu1 }
 0x9d2   : > { %v1750_v12 = vadd.f32 %v2254_v11, %v1749_v52 }
 0x9d4   : > { %1762 = vmax.xlane.f32.xlu0 %v1750_v12 }
 0x9d8   : > { %1764 = vmax.xlane.f32.xlu0 %v1755_v53 }
 0x9df   : > { %1824 = vrot.lane.b32.xlu1 %v3591_v8, %s3079_s5 }
 0x9e3   : > { %1820 = vrot.lane.b32.xlu1 %v3596_v60, %s3079_s5 }
 0x9e7   : > { %1816 = vrot.lane.b32.xlu1 %v3606_v62, %s3079_s5 }
 0x9eb   : > { %1812 = vrot.lane.b32.xlu1 %v3574_v49, %s3079_s5 }
 0x9ee   : > { %1822 = vrot.lane.b32.xlu0 %v3564_v47, %s3079_s5 }
 0x9ef   : > { %1810 = vrot.lane.b32.xlu1 %v3616_v17, %s3079_s5 }
 0x9f2   : > { %1818 = vrot.lane.b32.xlu0 %v3569_v48, %s3079_s5 }
 0x9f3   : > { %1806 = vrot.lane.b32.xlu1 %v3621_v18, %s3079_s5 }
 0x9f6   : > { %1814 = vrot.lane.b32.xlu0 %v3611_v63, %s3079_s5 }
 0x9f7   : > { %1802 = vrot.lane.b32.xlu1 %v3626_v19, %s3079_s5 }
 0x9fa   : > { %1808 = vrot.lane.b32.xlu0 %v3667_v44, %s3079_s5 }
 0x9fb   : > { %1798 = vrot.lane.b32.xlu1 %v3631_v20, %s3079_s5 }
 0x9fe   : > { %1804 = vrot.lane.b32.xlu0 %v3601_v61, %s3079_s5 }
 0xa02   : > { %1800 = vrot.lane.b32.xlu0 %v3638_v3, %s3079_s5 }
 0xa57   : > { %v1761_v47 = vpop.xlane.xlu1 %1760 }
 0xa58   : > { %v1767_v48 = vsub.f32 %v1745_v6, %v1761_v47 }
 0xa59   : > { %v1759_v49 = vpop.xlane.xlu0 %1758 }
 0xa5a   : > { %v1772_v8 = vmul.f32 1.442695, %v1767_v48  ;;  %v1766_v60 = vsub.f32 %v1740_v9, %v1759_v49 }
 0xa5b   : > { %v1825_v62 = vpop.permute.xlu1 %1824 }
 0xa5c   : > { %2939 = vpow2.f32 %v1772_v8  ;;  %v1770_v63 = vmul.f32 1.442695, %v1766_v60  ;;  %2761 = vmatprep.subr.mxu0 %v1825_v62 }
 0xa5d   : > { %v1763_v17 = vpop.xlane.xlu0 %1762  ;;  %2762 = vmatpush3.msra.mxu0 %v1825_v62 }
 0xa5e   : > { %2941 = vpow2.f32 %v1770_v63  ;;  %v1768_v18 = vsub.f32 %v1750_v12, %v1763_v17 }
 0xa5f   : > { %v1821_v19 = vpop.permute.xlu1 %1820 }
 0xa60   : > { %v1774_v20 = vmul.f32 1.442695, %v1768_v18 }
 0xa61   : > { %v1765_v44 = vpop.xlane.xlu0 %1764 }
 0xa62   : > { %2943 = vpow2.f32 %v1774_v20  ;;  %v1769_v61 = vsub.f32 %v1755_v53, %v1765_v44 }
 0xa63   : > { %v1817_v14 = vpop.permute.xlu1 %1816 }
 0xa64   : > { %v1776_v3 = vmul.f32 1.442695, %v1769_v61 }
 0xa65   : > { %v1823_v15 = vpop.permute.xlu0 %1822 }
 0xa66   : > { %2945 = vpow2.f32 %v1776_v3  ;;  %2763 = vmatprep.subr.mxu0 %v1823_v15 }
 0xa67   : > { %2764 = vmatpush3.msra.mxu0 %v1823_v15  ;;  %v1813_v16 = vpop.permute.xlu1 %1812 }
 0xa68   : > { %2765 = vmatprep.subr.mxu0 %v1821_v19 }
 0xa69   : > { %v2940_v33 = vpop.eup %2939  ;;  %2766 = vmatpush3.msra.mxu0 %v1821_v19  ;;  %v1819_v34 = vpop.permute.xlu0 %1818 }
 0xa6a   : > { %1780 = vadd.xlane.f32.xlu0 %v2940_v33  ;;  %2767 = vmatprep.subr.mxu0 %v1819_v34 }
 0xa6b   : > { %v2942_v35 = vpop.eup %2941  ;;  %2768 = vmatpush3.msra.mxu0 %v1819_v34  ;;  %v1811_v24 = vpop.permute.xlu1 %1810 }
 0xa6c   : > { %1778 = vadd.xlane.f32.xlu1 %v2942_v35  ;;  %2769 = vmatprep.subr.mxu0 %v1817_v14 }
 0xa6d   : > { %2770 = vmatpush3.msra.mxu0 %v1817_v14  ;;  %v1815_v25 = vpop.permute.xlu0 %1814 }
 0xa6e   : > { %2771 = vmatprep.subr.mxu0 %v1815_v25 }
 0xa6f   : > { %v2944_v26 = vpop.eup %2943  ;;  %2772 = vmatpush3.msra.mxu0 %v1815_v25  ;;  %v1807_v27 = vpop.permute.xlu1 %1806 }
 0xa70   : > { %1782 = vadd.xlane.f32.xlu1 %v2944_v26  ;;  %2773 = vmatprep.subr.mxu0 %v1813_v16 }
 0xa71   : > { %2774 = vmatpush3.msra.mxu0 %v1813_v16  ;;  %v1809_v28 = vpop.permute.xlu0 %1808 }
 0xa72   : > { %2775 = vmatprep.subr.mxu0 %v1811_v24 }
 0xa73   : > { %v2946_v31 = vpop.eup %2945  ;;  %2776 = vmatpush3.msra.mxu0 %v1811_v24  ;;  %v1803_v36 = vpop.permute.xlu1 %1802 }
 0xa74   : > { %1784 = vadd.xlane.f32.xlu0 %v2946_v31  ;;  %2777 = vmatprep.subr.mxu0 %v1809_v28 }
 0xa75   : > { %2778 = vmatpush3.msra.mxu0 %v1809_v28  ;;  %v1805_v32 = vpop.permute.xlu0 %1804 }
 0xa76   : > { %2779 = vmatprep.subr.mxu0 %v1807_v27 }
 0xa77   : > { %2780 = vmatpush3.msra.mxu0 %v1807_v27  ;;  %v1799_v38 = vpop.permute.xlu1 %1798 }
 0xa78   : > { %2781 = vmatprep.subr.mxu0 %v1805_v32 }
 0xa79   : > { %2782 = vmatpush3.msra.mxu0 %v1805_v32  ;;  %v1801_v37 = vpop.permute.xlu0 %1800 }
 0xa7a   : > { %2783 = vmatprep.subr.mxu0 %v1803_v36 }
 0xa7b   : > { %2784 = vmatpush3.msra.mxu0 %v1803_v36 }
 0xa7c   : > { %2785 = vmatprep.subr.mxu0 %v1801_v37 }
 0xa7d   : > { %2786 = vmatpush3.msra.mxu0 %v1801_v37 }
 0xa7e   : > { %2787 = vmatprep.subr.mxu0 %v1799_v38 }
 0xa7f   : > { %2788 = vmatpush3.msra.mxu0 %v1799_v38 }
 0xa81   : > { %1794 = vrot.lane.b32.xlu1 %v3649_v29, %s3079_s5  ;;  %v1927_v29 = vld [vmem:[%s3867_s2 + $0x18] sm:$0xff] }
 0xa8a   : > { %1796 = vrot.lane.b32.xlu0 %v3654_v30, %s3079_s5  ;;  %s3808_s5 = scalar_lea.hbm %s3869_s4, %s2284_s23 }
 0xaf3   : > { %v1781_v39 = vpop.xlane.xlu0 %1780 }
 0xaf4   : > { %2947 = vrcp.f32 %v1781_v39 }
 0xaf5   : > { %v1779_v40 = vpop.xlane.xlu1 %1778 }
 0xaf6   : > { %2949 = vrcp.f32 %v1779_v40 }
 0xaf9   : > { %v1783_v41 = vpop.xlane.xlu1 %1782 }
 0xafa   : > { %2951 = vrcp.f32 %v1783_v41 }
 0xafd   : > { %v1785_v42 = vpop.xlane.xlu0 %1784  ;;  %v1795_v45 = vpop.permute.xlu1 %1794 }
 0xafe   : > { %2953 = vrcp.f32 %v1785_v42 }
 0xb01   : > { %v1797_v43 = vpop.permute.xlu0 %1796  ;;  %v2948_v46 = vpop.eup %2947 }
 0xb02   : > { %2789 = vmatprep.subr.mxu0 %v1797_v43  ;;  %v1791_v55 = vmul.f32 %v2948_v46, %v2940_v33 }
 0xb03   : > { %v2950_v54 = vpop.eup %2949  ;;  %2790 = vmatpush3.msra.mxu0 %v1797_v43 }
 0xb04   : > { %2791 = vmatprep.subr.mxu0 %v1795_v45  ;;  %v1790_v30 = vmul.f32 %v2950_v54, %v2942_v35 }
 0xb05   : > { %2792 = vmatpush3.msra.mxu0 %v1795_v45 }
 0xb06   : > { %2793 = vmatprep.mubr.f32.mxu0 %v1790_v30  ;;  %2799 = vmatprep.subr.mxu0 %v1927_v29 }
 0xb07   : > { %v2952_v56 = vpop.eup %2951  ;;  %2794 = vmatmul.mubr.f32.vlgmr.msra.gmra.mxu0 %v1791_v55 }
 0xb08   : > { %v1792_v57 = vmul.f32 %v2952_v56, %v2944_v26  ;;  %2800 = vmatpush3.msra.mxu0 %v1927_v29 }
 0xb0a   : > { %2796 = vmatprep.mubr.f32.mxu0 %v1792_v57 }
 0xb0b   : > { %v2954_v59 = vpop.eup %2953 }
 0xb0c   : > { %v1793_v22 = vmul.f32 %v2954_v59, %v2946_v31 }
 0xb0e   : > { %2797 = vmatmul.mubr.f32.gmra.mxu0 %v1793_v22 }
 0xbc7   : > { %v2795_v23 = vpop.f32.mrf.mxu0 }
 0xbc9   : > { %v1908_v0 = vpop.f32.mrf.mxu0 }
 0xbca   : > { %2801 = vmatprep.mubr.msk.f32.mxu0 %vm313_vm0, %v1908_v0 }
 0xbcb   : > { %2802 = vmatmul.mubr.msk.f32.vlgmr.msra.gmra.mxu0 %vm313_vm0, %v2795_v23 }
 0xbce   : > { %v2798_v50 = vpop.f32.mrf.mxu0 }
 0xbd0   : > { %v1918_v51 = vpop.f32.mrf.mxu0 }
 0xbd1   : > { %2804 = vmatprep.mubr.msk.f32.mxu0 %vm313_vm0, %v1918_v51 }
 0xbd2   : > { %2805 = vmatmul.mubr.msk.f32.gmra.mxu0 %vm313_vm0, %v2798_v50 }
 0xc8b   : > { %v2803_v4 = vpop.f32.mrf.mxu0 }
 0xc8c   : > { %v2026_v6 = vadd.f32 %v2803_v4, %v3738_v58 }
 0xc8d   : > { %v2006_v7 = vpop.f32.mrf.mxu0 }
 0xc8e   : > { %v2037_v9 = vadd.f32 %v2280_v5, %v2026_v6  ;;  %v2025_v10 = vadd.f32 %v2006_v7, %v3740_v21 }
 0xc90   : > { %2042 = vst.msk [vmem:[%s219_s12 + $0x8] sm:$0xff] %vm2040_vm1, %v2037_v9  ;;  %v2036_v11 = vadd.f32 %v2280_v5, %v2025_v10 }
 0xc92   : > { %2041 = vst.msk [vmem:[%s219_s12] sm:$0xff] %vm2040_vm1, %v2036_v11  ;;  %v2806_v52 = vpop.f32.mrf.mxu0 }
 0xc93   : > { %v2028_v12 = vadd.f32 %v2806_v52, %v3746_v1 }
 0xc94   : > { %v2016_v58 = vpop.f32.mrf.mxu0 }
 0xc95   : > { %v2039_v13 = vadd.f32 %v2280_v5, %v2028_v12  ;;  %v2027_v53 = vadd.f32 %v2016_v58, %v3748_v2 }
 0xc97   : > { %2044 = vst.msk [vmem:[%s219_s12 + $0x18] sm:$0xff] %vm2040_vm1, %v2039_v13  ;;  %v2038_v21 = vadd.f32 %v2280_v5, %v2027_v53 }
 0xc99   : > { %2043 = vst.msk [vmem:[%s219_s12 + $0x10] sm:$0xff] %vm2040_vm1, %v2038_v21 }
 0xc9a   : > { %2988 = shalt.err (!%p2985_p10)
}
 0xc9b   : > { %s2989_s30 = scalar_lea.hbm %s3808_s5, 512  ;;  %s2993_s12 = scalar_lea.hbm %s3869_s4, 8192 }
 0xc9c   : > { %p2990_p11 = scmp.ne.s32.totalorder %s3808_s5, %s2989_s30  ;;  %p2994_p0 = scmp.lt.s32.totalorder %s3808_s5, %s3869_s4 }
 0xc9d   : > { %p2995_p1 = scmp.lt.s32.totalorder %s2993_s12, %s2989_s30 }
 0xc9e   : > { %p2991_p12 = pnand %p2990_p11, %p3159_p3 }
 0xc9f   : > { %p2996_p2 = por %p2995_p1, %p2994_p0 }
 0xca0   : > { %p2992_p13 = pneg %p2991_p12 }
 0xca2   : > { %p2997_p4 = pnand %p2996_p2, %p2992_p13 }
 0xca4   : > { %3000 = shalt.err (!%p2997_p4)
}
 0xca5   : > { %s3081_s18 = smov 128   ;;  %s3082_s19 = smov 8  }
 0xca6   : > { %2807 = dma.vmem_to_hbm [thread:$0]  (%p3159_p3), %s3810_s14, 512, %s3808_s5, %s3814_s13, %s3081_s18, %s3081_s18, %s3082_s19  }
 0xca7 PF: > { %p2813_p5 = scmp.ge.s32.totalorder %s3067_s22, 2  ;;  %s2076_s27 = sand.u32 1, %s3039_s15  }
 0xca8   : > { %s2077_s6 = scalar_lea.sflag [#allocation3], %s2076_s27 }
 0xca9   : > { %p2810_p6 = pnand %p2813_p5, %p3168_p8 }
 0xcab   : > { %p2811_p7 = pneg %p2810_p6 }
 0xcad   : > { %3034 = dma.done.wait (%p2811_p7), %s2077_s6, 512  }
 0xcae   : > { %3036 = vsyncadd (%p2811_p7), %s2077_s6, 4294966784  ;;  %s17_s22 = sadd.s32 1, %s3067_s22   ;;  %s3872_s15 = smov %s3043_s16 }
 0xcaf   : > { %p14_p9 = scmp.ge.s32.totalorder %s17_s22, 18   ;;  %s3873_s16 = smov %s3047_s17 }
 0xcb0   : > { %s3874_s17 = smov %s3177_s7  ;;  %s3875_s18 = smov %s3059_s20 }
 0xcb1   : > { %s3876_s19 = smov %s3063_s21  ;;  %s3877_s20 = smov %s3880_s25 }
 0xcb2   : > { %s3878_s21 = smov %s3884_s26  ;;  %16 = sbr.rel (!%p14_p9) target bundleno = 5 (0x5), region = 79 }
 0xcb7   :  { %2082 = vsyncpa [#allocation3], 1 }
 0xcb8   :  { %2084 = vsyncpa [#allocation3 + $0x1], 1 }

</bundles_post_ra>
